<compile_context>
chip_gen: v6e
topology: v6e:2x2x1
jax: 0.10.0
libtpu: 0.0.40
codegen_flags: <defaults>
</compile_context>

<pallas_src>
import functools

import jax
import jax.numpy as jnp
from jax.experimental import pallas as pl
from jax.experimental.pallas import tpu as pltpu


# ----------------------------------------------------------------------------
# in-kernel helpers
# ----------------------------------------------------------------------------
def _layernorm(x, g, b, eps=1e-5):
    mu = jnp.mean(x, axis=-1, keepdims=True)
    var = jnp.mean((x - mu) * (x - mu), axis=-1, keepdims=True)
    return (x - mu) * jax.lax.rsqrt(var + eps) * g + b


# ----------------------------------------------------------------------------
# fully fused encoder kernel: one batch *tile* per grid step
# ----------------------------------------------------------------------------
def _encoder_kernel(heads,
                    patches_ref, patch_w_ref, wqkv_ref, wo_ref,
                    w1_ref, w2_ref, hw1_ref, hw2_ref,
                    vecd_ref, vecw_ref, pos_ref,
                    out_ref, tok_ref, attn_ref):
    Bt, Np, pdim = patches_ref.shape
    D = patch_w_ref.shape[1]
    F = w1_ref.shape[1]
    MH = hw1_ref.shape[1]
    NOUT = hw2_ref.shape[1]
    S = Np + 1
    Dh = D // heads
    bf16, f32 = jnp.bfloat16, jnp.float32

    # --- unpack the packed per-channel vectors (f32) -------------------------
    patch_b = vecd_ref[0:1, :]
    cls_row = vecd_ref[1:2, :]            # CLS token + positional-emb row 0
    ln1_g, ln1_b = vecd_ref[2:3, :], vecd_ref[3:4, :]
    bo = vecd_ref[4:5, :]
    ln2_g, ln2_b = vecd_ref[5:6, :], vecd_ref[6:7, :]
    b2 = vecd_ref[7:8, :]
    ln3_g, ln3_b = vecd_ref[8:9, :], vecd_ref[9:10, :]
    bqkv = vecw_ref[0:1, 0:3 * D]         # Q part pre-scaled by 1/sqrt(Dh)
    b1 = vecw_ref[1:2, 0:F]
    hb1 = vecw_ref[2:3, 0:MH]
    hb2 = vecw_ref[3:4, 0:NOUT]

    # --- patch embedding: all batch rows of the tile stacked on the M dim ----
    pts = patches_ref[...].reshape(Bt * Np, pdim)                  # bf16
    emb = jnp.dot(pts, patch_w_ref[...], preferred_element_type=f32)
    # assemble tokens in VMEM scratch (no sublane concat)
    tok_ref[:, 0:1, :] = jnp.broadcast_to(cls_row.reshape(1, 1, D), (Bt, 1, D))
    tok_ref[:, 1:, :] = emb.reshape(Bt, Np, D) + patch_b + pos_ref[...]
    x = tok_ref[...].reshape(Bt * S, D)                            # f32 residual stream

    # --- pre-LN multi-head self-attention (residual fused) -------------------
    h = _layernorm(x, ln1_g, ln1_b).astype(bf16)
    qkv = jnp.dot(h, wqkv_ref[...], preferred_element_type=f32) + bqkv
    qkv3 = qkv.astype(bf16).reshape(Bt, S, 3 * D)
    for hh in range(heads):                                        # static unroll
        q = qkv3[:, :, hh * Dh:(hh + 1) * Dh]                      # scale pre-folded
        k = qkv3[:, :, D + hh * Dh:D + (hh + 1) * Dh]
        v = qkv3[:, :, 2 * D + hh * Dh:2 * D + (hh + 1) * Dh]
        s = jnp.einsum('bqd,bkd->bqk', q, k, preferred_element_type=f32)
        s = s - jnp.max(s, axis=-1, keepdims=True)
        p = jnp.exp(s)
        p = p * pl.reciprocal(jnp.sum(p, axis=-1, keepdims=True), approx=True)
        ctx = jnp.einsum('bqk,bkd->bqd', p.astype(bf16), v,
                         preferred_element_type=f32)
        attn_ref[:, :, hh * Dh:(hh + 1) * Dh] = ctx.astype(bf16)   # lane-offset write
    attn = attn_ref[...].reshape(Bt * S, D)                        # bf16
    o = jnp.dot(attn, wo_ref[...], preferred_element_type=f32) + bo
    x = x + o                                                      # residual in-kernel

    # --- pre-LN FFN (residual fused) ------------------------------------------
    h = _layernorm(x, ln2_g, ln2_b).astype(bf16)
    h1 = jnp.dot(h, w1_ref[...], preferred_element_type=f32) + b1
    # TODO(synk): PyTorch nn.GELU defaults to exact erf; tanh-approx used here.
    h1 = jax.nn.gelu(h1, approximate=True).astype(bf16)
    h2 = jnp.dot(h1, w2_ref[...], preferred_element_type=f32) + b2
    x = x + h2                                                     # residual in-kernel

    # --- final LayerNorm + MLP head, all CLS rows of the tile at once ---------
    cls = x.reshape(Bt, S, D)[:, 0, :]                             # (Bt, D)
    c = _layernorm(cls, ln3_g, ln3_b).astype(bf16)
    y = jnp.dot(c, hw1_ref[...], preferred_element_type=f32) + hb1
    y = jnp.maximum(y, 0.0).astype(bf16)
    y = jnp.dot(y, hw2_ref[...], preferred_element_type=f32) + hb2  # (Bt, NOUT) lane-dense
    out_ref[...] = y.reshape(Bt, 1, NOUT).astype(out_ref.dtype)


# ----------------------------------------------------------------------------
# Parameter init (deterministic, synthetic) + one-time host-side weight prep
# ----------------------------------------------------------------------------
def init_params(key, *, C, patch, img, D, heads, ffn, mlp_hidden, mlp_out):
    S = (img // patch) * (img // patch) + 1        # patches + CLS token
    ks = jax.random.split(key, 20)
    w = lambda k, shape, s=0.02: jax.random.normal(k, shape, jnp.float32) * s
    pdim = C * patch * patch
    return dict(
        patch=patch, heads=heads,
        patch_w=w(ks[0], (pdim, D)),
        patch_b=jnp.zeros((D,), jnp.float32),
        cls=w(ks[1], (1, 1, D)),
        pos=w(ks[2], (1, S, D)),
        ln1_g=jnp.ones((D,), jnp.float32), ln1_b=jnp.zeros((D,), jnp.float32),
        wqkv=w(ks[3], (D, 3 * D)), bqkv=jnp.zeros((3 * D,), jnp.float32),
        wo=w(ks[4], (D, D)), bo=jnp.zeros((D,), jnp.float32),
        ln2_g=jnp.ones((D,), jnp.float32), ln2_b=jnp.zeros((D,), jnp.float32),
        w_ffn1=w(ks[5], (D, ffn)), b_ffn1=jnp.zeros((ffn,), jnp.float32),
        w_ffn2=w(ks[6], (ffn, D)), b_ffn2=jnp.zeros((D,), jnp.float32),
        ln3_g=jnp.ones((D,), jnp.float32), ln3_b=jnp.zeros((D,), jnp.float32),
        mlp_w1=w(ks[7], (D, mlp_hidden)),
        mlp_b1=jnp.zeros((mlp_hidden,), jnp.float32),
        mlp_w2=w(ks[8], (mlp_hidden, mlp_out)),
        mlp_b2=jnp.zeros((mlp_out,), jnp.float32),
    )


def prepare_weights(params):
    """One-time host-side prep: bf16 casts, Q pre-scaling, bias/LN packing."""
    D = params["patch_w"].shape[1]
    heads = params["heads"]
    Dh = D // heads
    scale = 1.0 / (Dh ** 0.5)
    mlp_out = params["mlp_w2"].shape[1]
    nout_pad = ((mlp_out + 127) // 128) * 128
    F = params["w_ffn1"].shape[1]
    MH = params["mlp_w1"].shape[1]
    wmax = max(3 * D, F, MH, nout_pad)

    wqkv = params["wqkv"].at[:, :D].multiply(scale)        # fold 1/sqrt(Dh) into Q
    bqkv = params["bqkv"].at[:D].multiply(scale)
    mlp_w2 = jnp.pad(params["mlp_w2"], ((0, 0), (0, nout_pad - mlp_out)))
    mlp_b2 = jnp.pad(params["mlp_b2"], (0, nout_pad - mlp_out))

    cls_pos0 = params["cls"][0, 0] + params["pos"][0, 0]
    vecd = jnp.stack([params["patch_b"], cls_pos0,
                      params["ln1_g"], params["ln1_b"], params["bo"],
                      params["ln2_g"], params["ln2_b"], params["b_ffn2"],
                      params["ln3_g"], params["ln3_b"]], axis=0).astype(jnp.float32)
    pad = lambda v: jnp.pad(v, (0, wmax - v.shape[0]))
    vecw = jnp.stack([pad(bqkv), pad(params["b_ffn1"]),
                      pad(params["mlp_b1"]), pad(mlp_b2)], axis=0).astype(jnp.float32)

    bf = lambda a: a.astype(jnp.bfloat16)
    return dict(
        patch=params["patch"], heads=heads, mlp_out=mlp_out, nout_pad=nout_pad,
        patch_w=bf(params["patch_w"]), wqkv=bf(wqkv), wo=bf(params["wo"]),
        w_ffn1=bf(params["w_ffn1"]), w_ffn2=bf(params["w_ffn2"]),
        mlp_w1=bf(params["mlp_w1"]), mlp_w2=bf(mlp_w2),
        vecd=vecd, vecw=vecw,
        pos_rest=params["pos"][0, 1:, :].astype(jnp.float32),
    )


# ----------------------------------------------------------------------------
# wrapper helpers
# ----------------------------------------------------------------------------
def _pick_batch_tile(B):
    # Prefer >=2 grid steps (feeds both v7x TensorCores) while stacking as many
    # batch rows per step as possible (<=8) for MXU M-fill.
    upper = min(8, max(1, B // 2))
    for bt in range(upper, 0, -1):
        if B % bt == 0:
            return bt
    return 1


def _const_spec(shape, single_buffer):
    idx = lambda b: (0,) * len(shape)
    if single_buffer and hasattr(pl, "Buffered"):
        try:
            # grid-invariant weights: single buffer halves their VMEM footprint
            return pl.BlockSpec(shape, idx, pipeline_mode=pl.Buffered(1))
        except TypeError:
            pass
    return pl.BlockSpec(shape, idx)


# ----------------------------------------------------------------------------
# Forward: VLLIP_test_encoder(images) = mlp(base_encoder(images)[:, 0, :])
# ----------------------------------------------------------------------------
def vllip_test_encoder(prep, images):
    B, C, Hh, Ww = images.shape
    p = prep["patch"]
    heads = prep["heads"]
    nh, nw = Hh // p, Ww // p
    Np = nh * nw
    pdim = C * p * p
    D = prep["patch_w"].shape[1]
    S = Np + 1
    F = prep["w_ffn1"].shape[1]
    mlp_out = prep["mlp_out"]
    nout_pad = prep["nout_pad"]

    # TODO(synk): at production sizes pull patches straight from the NCHW image
    # via the BlockSpec index_map instead of this XLA im2col glue.
    patches = images.reshape(B, C, nh, p, nw, p)
    patches = patches.transpose(0, 2, 4, 1, 3, 5).reshape(B, Np, pdim)
    patches = patches.astype(jnp.bfloat16)          # halve activation DMA bytes

    Bt = _pick_batch_tile(B)
    grid = (B // Bt,)

    consts = [prep["patch_w"], prep["wqkv"], prep["wo"], prep["w_ffn1"],
              prep["w_ffn2"], prep["mlp_w1"], prep["mlp_w2"],
              prep["vecd"], prep["vecw"], prep["pos_rest"]]

    # VMEM budget derived from actual bytes (v5e scoped default is only 16 MiB).
    nbytes = lambda a: int(a.size) * a.dtype.itemsize
    blk_bytes = (Bt * Np * pdim * 2 + Bt * nout_pad * 4
                 + sum(nbytes(a) for a in consts))
    act_bytes = Bt * S * max(3 * D, F, D) * 4 * 8       # generous intermediate slack
    vmem_limit = int(min(64 << 20, max(16 << 20, 2 * blk_bytes + act_bytes + (2 << 20))))

    def run(single_buffer):
        in_specs = ([pl.BlockSpec((Bt, Np, pdim), lambda b: (b, 0, 0))]
                    + [_const_spec(a.shape, single_buffer) for a in consts])
        return pl.pallas_call(
            functools.partial(_encoder_kernel, heads),
            out_shape=jax.ShapeDtypeStruct((B, 1, nout_pad), jnp.float32),
            grid=grid,
            in_specs=in_specs,
            out_specs=pl.BlockSpec((Bt, 1, nout_pad), lambda b: (b, 0, 0)),
            scratch_shapes=[pltpu.VMEM((Bt, S, D), jnp.float32),    # token assembly
                            pltpu.VMEM((Bt, S, D), jnp.bfloat16)],  # per-head context
            compiler_params=pltpu.CompilerParams(
                dimension_semantics=("parallel",),
                vmem_limit_bytes=vmem_limit),
        )(patches, *consts)

    try:
        out = run(True)
    except Exception:
        # pl.Buffered(1) unsupported in this JAX build -> default double-buffering
        out = run(False)
    return out.reshape(B, nout_pad)[:, :mlp_out]


# ----------------------------------------------------------------------------
if __name__ == "__main__":
    key = jax.random.PRNGKey(0)
    k_img, k_par = jax.random.split(key)

    B, C, IMG = 2, 3, 16
    PATCH, D, HEADS, FFN = 8, 32, 4, 64
    MLP_HID, MLP_OUT = 64, 16

    images = jax.random.normal(k_img, (B, C, IMG, IMG), jnp.float32)
    params = init_params(k_par, C=C, patch=PATCH, img=IMG, D=D, heads=HEADS,
                         ffn=FFN, mlp_hidden=MLP_HID, mlp_out=MLP_OUT)
    prep = prepare_weights(params)

    out = vllip_test_encoder(prep, images)
    out = jax.block_until_ready(out)
    assert out.shape == (B, MLP_OUT) and out.dtype == jnp.float32
    print("KERNEL_OK")
</pallas_src>

<mosaic_0001>
module attributes {stable_mosaic.version = 11 : i64} {
  func.func @_encoder_kernel(%arg0: i32, %arg1: memref<1x4x192xbf16, #tpu.memory_space<vmem>>, %arg2: memref<192x32xbf16, #tpu.memory_space<vmem>>, %arg3: memref<32x96xbf16, #tpu.memory_space<vmem>>, %arg4: memref<32x32xbf16, #tpu.memory_space<vmem>>, %arg5: memref<32x64xbf16, #tpu.memory_space<vmem>>, %arg6: memref<64x32xbf16, #tpu.memory_space<vmem>>, %arg7: memref<32x64xbf16, #tpu.memory_space<vmem>>, %arg8: memref<64x128xbf16, #tpu.memory_space<vmem>>, %arg9: memref<10x32xf32, #tpu.memory_space<vmem>>, %arg10: memref<4x128xf32, #tpu.memory_space<vmem>>, %arg11: memref<4x32xf32, #tpu.memory_space<vmem>>, %arg12: memref<1x1x128xf32, #tpu.memory_space<vmem>>, %arg13: memref<1x5x32xf32, #tpu.memory_space<vmem>>, %arg14: memref<1x5x32xbf16, #tpu.memory_space<vmem>>) attributes {dimension_semantics = [#tpu.dimension_semantics<parallel>], iteration_bounds = array<i64: 2>, scalar_prefetch = 0 : i64, scratch_operands = 2 : i64, tpu.core_type = #tpu.core_type<tc>, window_params = [{transform_indices = @transform_0, window_bounds = array<i64: 1, 4, 192>}, {pipeline_mode = #tpu.pipeline_mode<synchronous>, transform_indices = @transform_1, window_bounds = array<i64: 192, 32>}, {pipeline_mode = #tpu.pipeline_mode<synchronous>, transform_indices = @transform_2, window_bounds = array<i64: 32, 96>}, {pipeline_mode = #tpu.pipeline_mode<synchronous>, transform_indices = @transform_3, window_bounds = array<i64: 32, 32>}, {pipeline_mode = #tpu.pipeline_mode<synchronous>, transform_indices = @transform_4, window_bounds = array<i64: 32, 64>}, {pipeline_mode = #tpu.pipeline_mode<synchronous>, transform_indices = @transform_5, window_bounds = array<i64: 64, 32>}, {pipeline_mode = #tpu.pipeline_mode<synchronous>, transform_indices = @transform_6, window_bounds = array<i64: 32, 64>}, {pipeline_mode = #tpu.pipeline_mode<synchronous>, transform_indices = @transform_7, window_bounds = array<i64: 64, 128>}, {pipeline_mode = #tpu.pipeline_mode<synchronous>, transform_indices = @transform_8, window_bounds = array<i64: 10, 32>}, {pipeline_mode = #tpu.pipeline_mode<synchronous>, transform_indices = @transform_9, window_bounds = array<i64: 4, 128>}, {pipeline_mode = #tpu.pipeline_mode<synchronous>, transform_indices = @transform_10, window_bounds = array<i64: 4, 32>}, {transform_indices = @transform_11, window_bounds = array<i64: 1, 1, 128>}]} {
    %c0 = arith.constant 0 : index
    %c0_0 = arith.constant 0 : index
    %0 = vector.load %arg9[%c0, %c0_0] : memref<10x32xf32, #tpu.memory_space<vmem>>, vector<1x32xf32>
    %c1 = arith.constant 1 : index
    %c0_1 = arith.constant 0 : index
    %1 = vector.load %arg9[%c1, %c0_1] : memref<10x32xf32, #tpu.memory_space<vmem>>, vector<1x32xf32>
    %c2 = arith.constant 2 : index
    %c0_2 = arith.constant 0 : index
    %2 = vector.load %arg9[%c2, %c0_2] : memref<10x32xf32, #tpu.memory_space<vmem>>, vector<1x32xf32>
    %c3 = arith.constant 3 : index
    %c0_3 = arith.constant 0 : index
    %3 = vector.load %arg9[%c3, %c0_3] : memref<10x32xf32, #tpu.memory_space<vmem>>, vector<1x32xf32>
    %c4 = arith.constant 4 : index
    %c0_4 = arith.constant 0 : index
    %4 = vector.load %arg9[%c4, %c0_4] : memref<10x32xf32, #tpu.memory_space<vmem>>, vector<1x32xf32>
    %c5 = arith.constant 5 : index
    %c0_5 = arith.constant 0 : index
    %5 = vector.load %arg9[%c5, %c0_5] : memref<10x32xf32, #tpu.memory_space<vmem>>, vector<1x32xf32>
    %c6 = arith.constant 6 : index
    %c0_6 = arith.constant 0 : index
    %6 = vector.load %arg9[%c6, %c0_6] : memref<10x32xf32, #tpu.memory_space<vmem>>, vector<1x32xf32>
    %c7 = arith.constant 7 : index
    %c0_7 = arith.constant 0 : index
    %7 = vector.load %arg9[%c7, %c0_7] : memref<10x32xf32, #tpu.memory_space<vmem>>, vector<1x32xf32>
    %c8 = arith.constant 8 : index
    %c0_8 = arith.constant 0 : index
    %8 = vector.load %arg9[%c8, %c0_8] : memref<10x32xf32, #tpu.memory_space<vmem>>, vector<1x32xf32>
    %c9 = arith.constant 9 : index
    %c0_9 = arith.constant 0 : index
    %9 = vector.load %arg9[%c9, %c0_9] : memref<10x32xf32, #tpu.memory_space<vmem>>, vector<1x32xf32>
    %c0_10 = arith.constant 0 : index
    %c0_11 = arith.constant 0 : index
    %10 = vector.load %arg10[%c0_10, %c0_11] : memref<4x128xf32, #tpu.memory_space<vmem>>, vector<1x96xf32>
    %c1_12 = arith.constant 1 : index
    %c0_13 = arith.constant 0 : index
    %11 = vector.load %arg10[%c1_12, %c0_13] : memref<4x128xf32, #tpu.memory_space<vmem>>, vector<1x64xf32>
    %c2_14 = arith.constant 2 : index
    %c0_15 = arith.constant 0 : index
    %12 = vector.load %arg10[%c2_14, %c0_15] : memref<4x128xf32, #tpu.memory_space<vmem>>, vector<1x64xf32>
    %c3_16 = arith.constant 3 : index
    %c0_17 = arith.constant 0 : index
    %13 = vector.load %arg10[%c3_16, %c0_17] : memref<4x128xf32, #tpu.memory_space<vmem>>, vector<1x128xf32>
    %c0_18 = arith.constant 0 : index
    %c0_19 = arith.constant 0 : index
    %c0_20 = arith.constant 0 : index
    %14 = vector.load %arg1[%c0_18, %c0_19, %c0_20] : memref<1x4x192xbf16, #tpu.memory_space<vmem>>, vector<1x4x192xbf16>
    %15 = vector.shape_cast %14 : vector<1x4x192xbf16> to vector<4x192xbf16>
    %c0_21 = arith.constant 0 : index
    %c0_22 = arith.constant 0 : index
    %16 = vector.load %arg2[%c0_21, %c0_22] : memref<192x32xbf16, #tpu.memory_space<vmem>>, vector<192x32xbf16>
    %cst = arith.constant dense<0.000000e+00> : vector<4x32xf32>
    %17 = tpu.matmul %15, %16, %cst {dimension_numbers = #tpu.dot_dimension_numbers<[1], [0], [0], [1], [0, 0, 1, 1], [], []>} : vector<4x192xbf16>, vector<192x32xbf16>, vector<4x32xf32> -> vector<4x32xf32>
    %18 = vector.shape_cast %1 : vector<1x32xf32> to vector<1x1x32xf32>
    %c0_23 = arith.constant 0 : index
    %c0_24 = arith.constant 0 : index
    %c0_25 = arith.constant 0 : index
    %19 = vector.load %arg13[%c0_23, %c0_24, %c0_25] : memref<1x5x32xf32, #tpu.memory_space<vmem>>, vector<1x1x32xf32>
    tpu.vector_store %arg13[%c0_23, %c0_24, %c0_25], %18 {strides = array<i32>} : memref<1x5x32xf32, #tpu.memory_space<vmem>>, vector<1x1x32xf32>,
    %20 = vector.shape_cast %17 : vector<4x32xf32> to vector<1x4x32xf32>
    %21 = vector.shape_cast %0 : vector<1x32xf32> to vector<1x1x32xf32>
    %22 = vector.broadcast %21 : vector<1x1x32xf32> to vector<1x4x32xf32>
    %23 = arith.addf %20, %22 : vector<1x4x32xf32>
    %c0_26 = arith.constant 0 : index
    %c0_27 = arith.constant 0 : index
    %24 = vector.load %arg11[%c0_26, %c0_27] : memref<4x32xf32, #tpu.memory_space<vmem>>, vector<4x32xf32>
    %25 = vector.shape_cast %24 : vector<4x32xf32> to vector<1x4x32xf32>
    %26 = arith.addf %23, %25 : vector<1x4x32xf32>
    %c0_28 = arith.constant 0 : index
    %c1_29 = arith.constant 1 : index
    %c0_30 = arith.constant 0 : index
    %27 = vector.load %arg13[%c0_28, %c1_29, %c0_30] : memref<1x5x32xf32, #tpu.memory_space<vmem>>, vector<1x4x32xf32>
    tpu.vector_store %arg13[%c0_28, %c1_29, %c0_30], %26 {strides = array<i32>} : memref<1x5x32xf32, #tpu.memory_space<vmem>>, vector<1x4x32xf32>,
    %c0_31 = arith.constant 0 : index
    %c0_32 = arith.constant 0 : index
    %c0_33 = arith.constant 0 : index
    %28 = vector.load %arg13[%c0_31, %c0_32, %c0_33] : memref<1x5x32xf32, #tpu.memory_space<vmem>>, vector<1x5x32xf32>
    %29 = vector.shape_cast %28 : vector<1x5x32xf32> to vector<5x32xf32>
    %cst_34 = arith.constant dense<0.000000e+00> : vector<5xf32>
    %30 = vector.multi_reduction <add>, %29, %cst_34 [1] : vector<5x32xf32> to vector<5xf32>
    %31 = vector.shape_cast %30 : vector<5xf32> to vector<5x1xf32>
    %cst_35 = arith.constant 3.200000e+01 : f32
    %32 = vector.broadcast %cst_35 : f32 to vector<5x1xf32>
    %33 = arith.divf %31, %32 : vector<5x1xf32>
    %34 = vector.broadcast %33 : vector<5x1xf32> to vector<5x32xf32>
    %35 = arith.subf %29, %34 : vector<5x32xf32>
    %36 = vector.broadcast %33 : vector<5x1xf32> to vector<5x32xf32>
    %37 = arith.subf %29, %36 : vector<5x32xf32>
    %38 = arith.mulf %35, %37 : vector<5x32xf32>
    %cst_36 = arith.constant dense<0.000000e+00> : vector<5xf32>
    %39 = vector.multi_reduction <add>, %38, %cst_36 [1] : vector<5x32xf32> to vector<5xf32>
    %40 = vector.shape_cast %39 : vector<5xf32> to vector<5x1xf32>
    %cst_37 = arith.constant 3.200000e+01 : f32
    %41 = vector.broadcast %cst_37 : f32 to vector<5x1xf32>
    %42 = arith.divf %40, %41 : vector<5x1xf32>
    %43 = vector.broadcast %33 : vector<5x1xf32> to vector<5x32xf32>
    %44 = arith.subf %29, %43 : vector<5x32xf32>
    %cst_38 = arith.constant 9.99999974E-6 : f32
    %45 = vector.broadcast %cst_38 : f32 to vector<5x1xf32>
    %46 = arith.addf %42, %45 : vector<5x1xf32>
    %47 = math.rsqrt %46 : vector<5x1xf32>
    %48 = vector.broadcast %47 : vector<5x1xf32> to vector<5x32xf32>
    %49 = arith.mulf %44, %48 : vector<5x32xf32>
    %50 = vector.broadcast %2 : vector<1x32xf32> to vector<5x32xf32>
    %51 = arith.mulf %49, %50 : vector<5x32xf32>
    %52 = vector.broadcast %3 : vector<1x32xf32> to vector<5x32xf32>
    %53 = arith.addf %51, %52 : vector<5x32xf32>
    %54 = arith.truncf %53 : vector<5x32xf32> to vector<5x32xbf16>
    %c0_39 = arith.constant 0 : index
    %c0_40 = arith.constant 0 : index
    %55 = vector.load %arg3[%c0_39, %c0_40] : memref<32x96xbf16, #tpu.memory_space<vmem>>, vector<32x96xbf16>
    %cst_41 = arith.constant dense<0.000000e+00> : vector<5x96xf32>
    %56 = tpu.matmul %54, %55, %cst_41 {dimension_numbers = #tpu.dot_dimension_numbers<[1], [0], [0], [1], [0, 0, 1, 1], [], []>} : vector<5x32xbf16>, vector<32x96xbf16>, vector<5x96xf32> -> vector<5x96xf32>
    %57 = vector.broadcast %10 : vector<1x96xf32> to vector<5x96xf32>
    %58 = arith.addf %56, %57 : vector<5x96xf32>
    %59 = arith.truncf %58 : vector<5x96xf32> to vector<5x96xbf16>
    %60 = vector.shape_cast %59 : vector<5x96xbf16> to vector<1x5x96xbf16>
    %61 = vector.extract_strided_slice %60 {offsets = [0, 0, 0], sizes = [1, 5, 8], strides = [1, 1, 1]} : vector<1x5x96xbf16> to vector<1x5x8xbf16>
    %62 = vector.extract_strided_slice %60 {offsets = [0, 0, 32], sizes = [1, 5, 8], strides = [1, 1, 1]} : vector<1x5x96xbf16> to vector<1x5x8xbf16>
    %63 = vector.extract_strided_slice %60 {offsets = [0, 0, 64], sizes = [1, 5, 8], strides = [1, 1, 1]} : vector<1x5x96xbf16> to vector<1x5x8xbf16>
    "tpu.trace_start"() <{level = 10 : i32, message = "bqd,bkd->bqk"}> : () -> ()
    %cst_42 = arith.constant dense<0.000000e+00> : vector<1x5x5xf32>
    %64 = tpu.matmul %61, %62, %cst_42 {dimension_numbers = #tpu.dot_dimension_numbers<[2], [2], [1], [1], [0, 0, 0, 1, 1, 1], [0], [0]>} : vector<1x5x8xbf16>, vector<1x5x8xbf16>, vector<1x5x5xf32> -> vector<1x5x5xf32>
    "tpu.trace_stop"() : () -> ()
    %cst_43 = arith.constant dense<0xFF800000> : vector<1x5xf32>
    %65 = vector.multi_reduction <maximumf>, %64, %cst_43 [2] : vector<1x5x5xf32> to vector<1x5xf32>
    %66 = vector.shape_cast %65 : vector<1x5xf32> to vector<1x5x1xf32>
    %67 = vector.broadcast %66 : vector<1x5x1xf32> to vector<1x5x5xf32>
    %68 = arith.subf %64, %67 : vector<1x5x5xf32>
    %69 = math.exp %68 : vector<1x5x5xf32>
    %cst_44 = arith.constant dense<0.000000e+00> : vector<1x5xf32>
    %70 = vector.multi_reduction <add>, %69, %cst_44 [2] : vector<1x5x5xf32> to vector<1x5xf32>
    %71 = vector.shape_cast %70 : vector<1x5xf32> to vector<1x5x1xf32>
    %72 = tpu.reciprocal %71 {approx = true} : vector<1x5x1xf32> -> vector<1x5x1xf32>
    %73 = vector.broadcast %72 : vector<1x5x1xf32> to vector<1x5x5xf32>
    %74 = arith.mulf %69, %73 : vector<1x5x5xf32>
    %75 = arith.truncf %74 : vector<1x5x5xf32> to vector<1x5x5xbf16>
    "tpu.trace_start"() <{level = 10 : i32, message = "bqk,bkd->bqd"}> : () -> ()
    %cst_45 = arith.constant dense<0.000000e+00> : vector<1x5x8xf32>
    %76 = tpu.matmul %75, %63, %cst_45 {dimension_numbers = #tpu.dot_dimension_numbers<[2], [1], [1], [2], [0, 0, 0, 1, 1, 2], [0], [0]>} : vector<1x5x5xbf16>, vector<1x5x8xbf16>, vector<1x5x8xf32> -> vector<1x5x8xf32>
    "tpu.trace_stop"() : () -> ()
    %77 = arith.truncf %76 : vector<1x5x8xf32> to vector<1x5x8xbf16>
    %c0_46 = arith.constant 0 : index
    %c0_47 = arith.constant 0 : index
    %c0_48 = arith.constant 0 : index
    %78 = vector.load %arg14[%c0_46, %c0_47, %c0_48] : memref<1x5x32xbf16, #tpu.memory_space<vmem>>, vector<1x5x8xbf16>
    tpu.vector_store %arg14[%c0_46, %c0_47, %c0_48], %77 {strides = array<i32>} : memref<1x5x32xbf16, #tpu.memory_space<vmem>>, vector<1x5x8xbf16>,
    %79 = vector.extract_strided_slice %60 {offsets = [0, 0, 8], sizes = [1, 5, 8], strides = [1, 1, 1]} : vector<1x5x96xbf16> to vector<1x5x8xbf16>
    %80 = vector.extract_strided_slice %60 {offsets = [0, 0, 40], sizes = [1, 5, 8], strides = [1, 1, 1]} : vector<1x5x96xbf16> to vector<1x5x8xbf16>
    %81 = vector.extract_strided_slice %60 {offsets = [0, 0, 72], sizes = [1, 5, 8], strides = [1, 1, 1]} : vector<1x5x96xbf16> to vector<1x5x8xbf16>
    "tpu.trace_start"() <{level = 10 : i32, message = "bqd,bkd->bqk"}> : () -> ()
    %cst_49 = arith.constant dense<0.000000e+00> : vector<1x5x5xf32>
    %82 = tpu.matmul %79, %80, %cst_49 {dimension_numbers = #tpu.dot_dimension_numbers<[2], [2], [1], [1], [0, 0, 0, 1, 1, 1], [0], [0]>} : vector<1x5x8xbf16>, vector<1x5x8xbf16>, vector<1x5x5xf32> -> vector<1x5x5xf32>
    "tpu.trace_stop"() : () -> ()
    %cst_50 = arith.constant dense<0xFF800000> : vector<1x5xf32>
    %83 = vector.multi_reduction <maximumf>, %82, %cst_50 [2] : vector<1x5x5xf32> to vector<1x5xf32>
    %84 = vector.shape_cast %83 : vector<1x5xf32> to vector<1x5x1xf32>
    %85 = vector.broadcast %84 : vector<1x5x1xf32> to vector<1x5x5xf32>
    %86 = arith.subf %82, %85 : vector<1x5x5xf32>
    %87 = math.exp %86 : vector<1x5x5xf32>
    %cst_51 = arith.constant dense<0.000000e+00> : vector<1x5xf32>
    %88 = vector.multi_reduction <add>, %87, %cst_51 [2] : vector<1x5x5xf32> to vector<1x5xf32>
    %89 = vector.shape_cast %88 : vector<1x5xf32> to vector<1x5x1xf32>
    %90 = tpu.reciprocal %89 {approx = true} : vector<1x5x1xf32> -> vector<1x5x1xf32>
    %91 = vector.broadcast %90 : vector<1x5x1xf32> to vector<1x5x5xf32>
    %92 = arith.mulf %87, %91 : vector<1x5x5xf32>
    %93 = arith.truncf %92 : vector<1x5x5xf32> to vector<1x5x5xbf16>
    "tpu.trace_start"() <{level = 10 : i32, message = "bqk,bkd->bqd"}> : () -> ()
    %cst_52 = arith.constant dense<0.000000e+00> : vector<1x5x8xf32>
    %94 = tpu.matmul %93, %81, %cst_52 {dimension_numbers = #tpu.dot_dimension_numbers<[2], [1], [1], [2], [0, 0, 0, 1, 1, 2], [0], [0]>} : vector<1x5x5xbf16>, vector<1x5x8xbf16>, vector<1x5x8xf32> -> vector<1x5x8xf32>
    "tpu.trace_stop"() : () -> ()
    %95 = arith.truncf %94 : vector<1x5x8xf32> to vector<1x5x8xbf16>
    %c0_53 = arith.constant 0 : index
    %c0_54 = arith.constant 0 : index
    %c8_55 = arith.constant 8 : index
    %96 = vector.load %arg14[%c0_53, %c0_54, %c8_55] : memref<1x5x32xbf16, #tpu.memory_space<vmem>>, vector<1x5x8xbf16>
    tpu.vector_store %arg14[%c0_53, %c0_54, %c8_55], %95 {strides = array<i32>} : memref<1x5x32xbf16, #tpu.memory_space<vmem>>, vector<1x5x8xbf16>,
    %97 = vector.extract_strided_slice %60 {offsets = [0, 0, 16], sizes = [1, 5, 8], strides = [1, 1, 1]} : vector<1x5x96xbf16> to vector<1x5x8xbf16>
    %98 = vector.extract_strided_slice %60 {offsets = [0, 0, 48], sizes = [1, 5, 8], strides = [1, 1, 1]} : vector<1x5x96xbf16> to vector<1x5x8xbf16>
    %99 = vector.extract_strided_slice %60 {offsets = [0, 0, 80], sizes = [1, 5, 8], strides = [1, 1, 1]} : vector<1x5x96xbf16> to vector<1x5x8xbf16>
    "tpu.trace_start"() <{level = 10 : i32, message = "bqd,bkd->bqk"}> : () -> ()
    %cst_56 = arith.constant dense<0.000000e+00> : vector<1x5x5xf32>
    %100 = tpu.matmul %97, %98, %cst_56 {dimension_numbers = #tpu.dot_dimension_numbers<[2], [2], [1], [1], [0, 0, 0, 1, 1, 1], [0], [0]>} : vector<1x5x8xbf16>, vector<1x5x8xbf16>, vector<1x5x5xf32> -> vector<1x5x5xf32>
    "tpu.trace_stop"() : () -> ()
    %cst_57 = arith.constant dense<0xFF800000> : vector<1x5xf32>
    %101 = vector.multi_reduction <maximumf>, %100, %cst_57 [2] : vector<1x5x5xf32> to vector<1x5xf32>
    %102 = vector.shape_cast %101 : vector<1x5xf32> to vector<1x5x1xf32>
    %103 = vector.broadcast %102 : vector<1x5x1xf32> to vector<1x5x5xf32>
    %104 = arith.subf %100, %103 : vector<1x5x5xf32>
    %105 = math.exp %104 : vector<1x5x5xf32>
    %cst_58 = arith.constant dense<0.000000e+00> : vector<1x5xf32>
    %106 = vector.multi_reduction <add>, %105, %cst_58 [2] : vector<1x5x5xf32> to vector<1x5xf32>
    %107 = vector.shape_cast %106 : vector<1x5xf32> to vector<1x5x1xf32>
    %108 = tpu.reciprocal %107 {approx = true} : vector<1x5x1xf32> -> vector<1x5x1xf32>
    %109 = vector.broadcast %108 : vector<1x5x1xf32> to vector<1x5x5xf32>
    %110 = arith.mulf %105, %109 : vector<1x5x5xf32>
    %111 = arith.truncf %110 : vector<1x5x5xf32> to vector<1x5x5xbf16>
    "tpu.trace_start"() <{level = 10 : i32, message = "bqk,bkd->bqd"}> : () -> ()
    %cst_59 = arith.constant dense<0.000000e+00> : vector<1x5x8xf32>
    %112 = tpu.matmul %111, %99, %cst_59 {dimension_numbers = #tpu.dot_dimension_numbers<[2], [1], [1], [2], [0, 0, 0, 1, 1, 2], [0], [0]>} : vector<1x5x5xbf16>, vector<1x5x8xbf16>, vector<1x5x8xf32> -> vector<1x5x8xf32>
    "tpu.trace_stop"() : () -> ()
    %113 = arith.truncf %112 : vector<1x5x8xf32> to vector<1x5x8xbf16>
    %c0_60 = arith.constant 0 : index
    %c0_61 = arith.constant 0 : index
    %c16 = arith.constant 16 : index
    %114 = vector.load %arg14[%c0_60, %c0_61, %c16] : memref<1x5x32xbf16, #tpu.memory_space<vmem>>, vector<1x5x8xbf16>
    tpu.vector_store %arg14[%c0_60, %c0_61, %c16], %113 {strides = array<i32>} : memref<1x5x32xbf16, #tpu.memory_space<vmem>>, vector<1x5x8xbf16>,
    %115 = vector.extract_strided_slice %60 {offsets = [0, 0, 24], sizes = [1, 5, 8], strides = [1, 1, 1]} : vector<1x5x96xbf16> to vector<1x5x8xbf16>
    %116 = vector.extract_strided_slice %60 {offsets = [0, 0, 56], sizes = [1, 5, 8], strides = [1, 1, 1]} : vector<1x5x96xbf16> to vector<1x5x8xbf16>
    %117 = vector.extract_strided_slice %60 {offsets = [0, 0, 88], sizes = [1, 5, 8], strides = [1, 1, 1]} : vector<1x5x96xbf16> to vector<1x5x8xbf16>
    "tpu.trace_start"() <{level = 10 : i32, message = "bqd,bkd->bqk"}> : () -> ()
    %cst_62 = arith.constant dense<0.000000e+00> : vector<1x5x5xf32>
    %118 = tpu.matmul %115, %116, %cst_62 {dimension_numbers = #tpu.dot_dimension_numbers<[2], [2], [1], [1], [0, 0, 0, 1, 1, 1], [0], [0]>} : vector<1x5x8xbf16>, vector<1x5x8xbf16>, vector<1x5x5xf32> -> vector<1x5x5xf32>
    "tpu.trace_stop"() : () -> ()
    %cst_63 = arith.constant dense<0xFF800000> : vector<1x5xf32>
    %119 = vector.multi_reduction <maximumf>, %118, %cst_63 [2] : vector<1x5x5xf32> to vector<1x5xf32>
    %120 = vector.shape_cast %119 : vector<1x5xf32> to vector<1x5x1xf32>
    %121 = vector.broadcast %120 : vector<1x5x1xf32> to vector<1x5x5xf32>
    %122 = arith.subf %118, %121 : vector<1x5x5xf32>
    %123 = math.exp %122 : vector<1x5x5xf32>
    %cst_64 = arith.constant dense<0.000000e+00> : vector<1x5xf32>
    %124 = vector.multi_reduction <add>, %123, %cst_64 [2] : vector<1x5x5xf32> to vector<1x5xf32>
    %125 = vector.shape_cast %124 : vector<1x5xf32> to vector<1x5x1xf32>
    %126 = tpu.reciprocal %125 {approx = true} : vector<1x5x1xf32> -> vector<1x5x1xf32>
    %127 = vector.broadcast %126 : vector<1x5x1xf32> to vector<1x5x5xf32>
    %128 = arith.mulf %123, %127 : vector<1x5x5xf32>
    %129 = arith.truncf %128 : vector<1x5x5xf32> to vector<1x5x5xbf16>
    "tpu.trace_start"() <{level = 10 : i32, message = "bqk,bkd->bqd"}> : () -> ()
    %cst_65 = arith.constant dense<0.000000e+00> : vector<1x5x8xf32>
    %130 = tpu.matmul %129, %117, %cst_65 {dimension_numbers = #tpu.dot_dimension_numbers<[2], [1], [1], [2], [0, 0, 0, 1, 1, 2], [0], [0]>} : vector<1x5x5xbf16>, vector<1x5x8xbf16>, vector<1x5x8xf32> -> vector<1x5x8xf32>
    "tpu.trace_stop"() : () -> ()
    %131 = arith.truncf %130 : vector<1x5x8xf32> to vector<1x5x8xbf16>
    %c0_66 = arith.constant 0 : index
    %c0_67 = arith.constant 0 : index
    %c24 = arith.constant 24 : index
    %132 = vector.load %arg14[%c0_66, %c0_67, %c24] : memref<1x5x32xbf16, #tpu.memory_space<vmem>>, vector<1x5x8xbf16>
    tpu.vector_store %arg14[%c0_66, %c0_67, %c24], %131 {strides = array<i32>} : memref<1x5x32xbf16, #tpu.memory_space<vmem>>, vector<1x5x8xbf16>,
    %c0_68 = arith.constant 0 : index
    %c0_69 = arith.constant 0 : index
    %c0_70 = arith.constant 0 : index
    %133 = vector.load %arg14[%c0_68, %c0_69, %c0_70] : memref<1x5x32xbf16, #tpu.memory_space<vmem>>, vector<1x5x32xbf16>
    %134 = vector.shape_cast %133 : vector<1x5x32xbf16> to vector<5x32xbf16>
    %c0_71 = arith.constant 0 : index
    %c0_72 = arith.constant 0 : index
    %135 = vector.load %arg4[%c0_71, %c0_72] : memref<32x32xbf16, #tpu.memory_space<vmem>>, vector<32x32xbf16>
    %cst_73 = arith.constant dense<0.000000e+00> : vector<5x32xf32>
    %136 = tpu.matmul %134, %135, %cst_73 {dimension_numbers = #tpu.dot_dimension_numbers<[1], [0], [0], [1], [0, 0, 1, 1], [], []>} : vector<5x32xbf16>, vector<32x32xbf16>, vector<5x32xf32> -> vector<5x32xf32>
    %137 = vector.broadcast %4 : vector<1x32xf32> to vector<5x32xf32>
    %138 = arith.addf %136, %137 : vector<5x32xf32>
    %139 = arith.addf %29, %138 : vector<5x32xf32>
    %cst_74 = arith.constant dense<0.000000e+00> : vector<5xf32>
    %140 = vector.multi_reduction <add>, %139, %cst_74 [1] : vector<5x32xf32> to vector<5xf32>
    %141 = vector.shape_cast %140 : vector<5xf32> to vector<5x1xf32>
    %cst_75 = arith.constant 3.200000e+01 : f32
    %142 = vector.broadcast %cst_75 : f32 to vector<5x1xf32>
    %143 = arith.divf %141, %142 : vector<5x1xf32>
    %144 = vector.broadcast %143 : vector<5x1xf32> to vector<5x32xf32>
    %145 = arith.subf %139, %144 : vector<5x32xf32>
    %146 = vector.broadcast %143 : vector<5x1xf32> to vector<5x32xf32>
    %147 = arith.subf %139, %146 : vector<5x32xf32>
    %148 = arith.mulf %145, %147 : vector<5x32xf32>
    %cst_76 = arith.constant dense<0.000000e+00> : vector<5xf32>
    %149 = vector.multi_reduction <add>, %148, %cst_76 [1] : vector<5x32xf32> to vector<5xf32>
    %150 = vector.shape_cast %149 : vector<5xf32> to vector<5x1xf32>
    %cst_77 = arith.constant 3.200000e+01 : f32
    %151 = vector.broadcast %cst_77 : f32 to vector<5x1xf32>
    %152 = arith.divf %150, %151 : vector<5x1xf32>
    %153 = vector.broadcast %143 : vector<5x1xf32> to vector<5x32xf32>
    %154 = arith.subf %139, %153 : vector<5x32xf32>
    %cst_78 = arith.constant 9.99999974E-6 : f32
    %155 = vector.broadcast %cst_78 : f32 to vector<5x1xf32>
    %156 = arith.addf %152, %155 : vector<5x1xf32>
    %157 = math.rsqrt %156 : vector<5x1xf32>
    %158 = vector.broadcast %157 : vector<5x1xf32> to vector<5x32xf32>
    %159 = arith.mulf %154, %158 : vector<5x32xf32>
    %160 = vector.broadcast %5 : vector<1x32xf32> to vector<5x32xf32>
    %161 = arith.mulf %159, %160 : vector<5x32xf32>
    %162 = vector.broadcast %6 : vector<1x32xf32> to vector<5x32xf32>
    %163 = arith.addf %161, %162 : vector<5x32xf32>
    %164 = arith.truncf %163 : vector<5x32xf32> to vector<5x32xbf16>
    %c0_79 = arith.constant 0 : index
    %c0_80 = arith.constant 0 : index
    %165 = vector.load %arg5[%c0_79, %c0_80] : memref<32x64xbf16, #tpu.memory_space<vmem>>, vector<32x64xbf16>
    %cst_81 = arith.constant dense<0.000000e+00> : vector<5x64xf32>
    %166 = tpu.matmul %164, %165, %cst_81 {dimension_numbers = #tpu.dot_dimension_numbers<[1], [0], [0], [1], [0, 0, 1, 1], [], []>} : vector<5x32xbf16>, vector<32x64xbf16>, vector<5x64xf32> -> vector<5x64xf32>
    %167 = vector.broadcast %11 : vector<1x64xf32> to vector<5x64xf32>
    %168 = arith.addf %166, %167 : vector<5x64xf32>
    %169 = arith.mulf %168, %168 : vector<5x64xf32>
    %170 = arith.mulf %168, %169 : vector<5x64xf32>
    %cst_82 = arith.constant 4.471500e-02 : f32
    %171 = vector.broadcast %cst_82 : f32 to vector<5x64xf32>
    %172 = arith.mulf %171, %170 : vector<5x64xf32>
    %173 = arith.addf %168, %172 : vector<5x64xf32>
    %cst_83 = arith.constant 0.797884583 : f32
    %174 = vector.broadcast %cst_83 : f32 to vector<5x64xf32>
    %175 = arith.mulf %174, %173 : vector<5x64xf32>
    %176 = math.tanh %175 : vector<5x64xf32>
    %cst_84 = arith.constant 1.000000e+00 : f32
    %177 = vector.broadcast %cst_84 : f32 to vector<5x64xf32>
    %178 = arith.addf %177, %176 : vector<5x64xf32>
    %cst_85 = arith.constant 5.000000e-01 : f32
    %179 = vector.broadcast %cst_85 : f32 to vector<5x64xf32>
    %180 = arith.mulf %179, %178 : vector<5x64xf32>
    %181 = arith.mulf %168, %180 : vector<5x64xf32>
    %182 = arith.truncf %181 : vector<5x64xf32> to vector<5x64xbf16>
    %c0_86 = arith.constant 0 : index
    %c0_87 = arith.constant 0 : index
    %183 = vector.load %arg6[%c0_86, %c0_87] : memref<64x32xbf16, #tpu.memory_space<vmem>>, vector<64x32xbf16>
    %cst_88 = arith.constant dense<0.000000e+00> : vector<5x32xf32>
    %184 = tpu.matmul %182, %183, %cst_88 {dimension_numbers = #tpu.dot_dimension_numbers<[1], [0], [0], [1], [0, 0, 1, 1], [], []>} : vector<5x64xbf16>, vector<64x32xbf16>, vector<5x32xf32> -> vector<5x32xf32>
    %185 = vector.broadcast %7 : vector<1x32xf32> to vector<5x32xf32>
    %186 = arith.addf %184, %185 : vector<5x32xf32>
    %187 = arith.addf %139, %186 : vector<5x32xf32>
    %188 = vector.shape_cast %187 : vector<5x32xf32> to vector<1x5x32xf32>
    %189 = vector.extract_strided_slice %188 {offsets = [0, 0, 0], sizes = [1, 1, 32], strides = [1, 1, 1]} : vector<1x5x32xf32> to vector<1x1x32xf32>
    %190 = vector.shape_cast %189 : vector<1x1x32xf32> to vector<1x32xf32>
    %cst_89 = arith.constant dense<0.000000e+00> : vector<1xf32>
    %191 = vector.multi_reduction <add>, %190, %cst_89 [1] : vector<1x32xf32> to vector<1xf32>
    %192 = vector.shape_cast %191 : vector<1xf32> to vector<1x1xf32>
    %cst_90 = arith.constant 3.200000e+01 : f32
    %193 = vector.broadcast %cst_90 : f32 to vector<1x1xf32>
    %194 = arith.divf %192, %193 : vector<1x1xf32>
    %195 = vector.broadcast %194 : vector<1x1xf32> to vector<1x32xf32>
    %196 = arith.subf %190, %195 : vector<1x32xf32>
    %197 = vector.broadcast %194 : vector<1x1xf32> to vector<1x32xf32>
    %198 = arith.subf %190, %197 : vector<1x32xf32>
    %199 = arith.mulf %196, %198 : vector<1x32xf32>
    %cst_91 = arith.constant dense<0.000000e+00> : vector<1xf32>
    %200 = vector.multi_reduction <add>, %199, %cst_91 [1] : vector<1x32xf32> to vector<1xf32>
    %201 = vector.shape_cast %200 : vector<1xf32> to vector<1x1xf32>
    %cst_92 = arith.constant 3.200000e+01 : f32
    %202 = vector.broadcast %cst_92 : f32 to vector<1x1xf32>
    %203 = arith.divf %201, %202 : vector<1x1xf32>
    %204 = vector.broadcast %194 : vector<1x1xf32> to vector<1x32xf32>
    %205 = arith.subf %190, %204 : vector<1x32xf32>
    %cst_93 = arith.constant 9.99999974E-6 : f32
    %206 = vector.broadcast %cst_93 : f32 to vector<1x1xf32>
    %207 = arith.addf %203, %206 : vector<1x1xf32>
    %208 = math.rsqrt %207 : vector<1x1xf32>
    %209 = vector.broadcast %208 : vector<1x1xf32> to vector<1x32xf32>
    %210 = arith.mulf %205, %209 : vector<1x32xf32>
    %211 = arith.mulf %210, %8 : vector<1x32xf32>
    %212 = arith.addf %211, %9 : vector<1x32xf32>
    %213 = arith.truncf %212 : vector<1x32xf32> to vector<1x32xbf16>
    %c0_94 = arith.constant 0 : index
    %c0_95 = arith.constant 0 : index
    %214 = vector.load %arg7[%c0_94, %c0_95] : memref<32x64xbf16, #tpu.memory_space<vmem>>, vector<32x64xbf16>
    %cst_96 = arith.constant dense<0.000000e+00> : vector<1x64xf32>
    %215 = tpu.matmul %213, %214, %cst_96 {dimension_numbers = #tpu.dot_dimension_numbers<[1], [0], [0], [1], [0, 0, 1, 1], [], []>} : vector<1x32xbf16>, vector<32x64xbf16>, vector<1x64xf32> -> vector<1x64xf32>
    %216 = arith.addf %215, %12 : vector<1x64xf32>
    %cst_97 = arith.constant 0.000000e+00 : f32
    %217 = vector.broadcast %cst_97 : f32 to vector<1x64xf32>
    %218 = arith.maximumf %216, %217 : vector<1x64xf32>
    %219 = arith.truncf %218 : vector<1x64xf32> to vector<1x64xbf16>
    %c0_98 = arith.constant 0 : index
    %c0_99 = arith.constant 0 : index
    %220 = vector.load %arg8[%c0_98, %c0_99] : memref<64x128xbf16, #tpu.memory_space<vmem>>, vector<64x128xbf16>
    %cst_100 = arith.constant dense<0.000000e+00> : vector<1x128xf32>
    %221 = tpu.matmul %219, %220, %cst_100 {dimension_numbers = #tpu.dot_dimension_numbers<[1], [0], [0], [1], [0, 0, 1, 1], [], []>} : vector<1x64xbf16>, vector<64x128xbf16>, vector<1x128xf32> -> vector<1x128xf32>
    %222 = arith.addf %221, %13 : vector<1x128xf32>
    %223 = vector.shape_cast %222 : vector<1x128xf32> to vector<1x1x128xf32>
    %c0_101 = arith.constant 0 : index
    %c0_102 = arith.constant 0 : index
    %c0_103 = arith.constant 0 : index
    %224 = vector.load %arg12[%c0_101, %c0_102, %c0_103] : memref<1x1x128xf32, #tpu.memory_space<vmem>>, vector<1x1x128xf32>
    tpu.vector_store %arg12[%c0_101, %c0_102, %c0_103], %223 {strides = array<i32>} : memref<1x1x128xf32, #tpu.memory_space<vmem>>, vector<1x1x128xf32>,
    return
  }
  func.func @transform_0(%arg0: i32) -> (i32, i32, i32) {
    %c0_i32 = arith.constant 0 : i32
    %c0_i32_0 = arith.constant 0 : i32
    %c0_i32_1 = arith.constant 0 : i32
    return %arg0, %c0_i32, %c0_i32_0 : i32, i32, i32
  }
  func.func @transform_1(%arg0: i32) -> (i32, i32) {
    %c0_i32 = arith.constant 0 : i32
    %c0_i32_0 = arith.constant 0 : i32
    %c0_i32_1 = arith.constant 0 : i32
    return %c0_i32, %c0_i32_0 : i32, i32
  }
  func.func @transform_2(%arg0: i32) -> (i32, i32) {
    %c0_i32 = arith.constant 0 : i32
    %c0_i32_0 = arith.constant 0 : i32
    %c0_i32_1 = arith.constant 0 : i32
    return %c0_i32, %c0_i32_0 : i32, i32
  }
  func.func @transform_3(%arg0: i32) -> (i32, i32) {
    %c0_i32 = arith.constant 0 : i32
    %c0_i32_0 = arith.constant 0 : i32
    %c0_i32_1 = arith.constant 0 : i32
    return %c0_i32, %c0_i32_0 : i32, i32
  }
  func.func @transform_4(%arg0: i32) -> (i32, i32) {
    %c0_i32 = arith.constant 0 : i32
    %c0_i32_0 = arith.constant 0 : i32
    %c0_i32_1 = arith.constant 0 : i32
    return %c0_i32, %c0_i32_0 : i32, i32
  }
  func.func @transform_5(%arg0: i32) -> (i32, i32) {
    %c0_i32 = arith.constant 0 : i32
    %c0_i32_0 = arith.constant 0 : i32
    %c0_i32_1 = arith.constant 0 : i32
    return %c0_i32, %c0_i32_0 : i32, i32
  }
  func.func @transform_6(%arg0: i32) -> (i32, i32) {
    %c0_i32 = arith.constant 0 : i32
    %c0_i32_0 = arith.constant 0 : i32
    %c0_i32_1 = arith.constant 0 : i32
    return %c0_i32, %c0_i32_0 : i32, i32
  }
  func.func @transform_7(%arg0: i32) -> (i32, i32) {
    %c0_i32 = arith.constant 0 : i32
    %c0_i32_0 = arith.constant 0 : i32
    %c0_i32_1 = arith.constant 0 : i32
    return %c0_i32, %c0_i32_0 : i32, i32
  }
  func.func @transform_8(%arg0: i32) -> (i32, i32) {
    %c0_i32 = arith.constant 0 : i32
    %c0_i32_0 = arith.constant 0 : i32
    %c0_i32_1 = arith.constant 0 : i32
    return %c0_i32, %c0_i32_0 : i32, i32
  }
  func.func @transform_9(%arg0: i32) -> (i32, i32) {
    %c0_i32 = arith.constant 0 : i32
    %c0_i32_0 = arith.constant 0 : i32
    %c0_i32_1 = arith.constant 0 : i32
    return %c0_i32, %c0_i32_0 : i32, i32
  }
  func.func @transform_10(%arg0: i32) -> (i32, i32) {
    %c0_i32 = arith.constant 0 : i32
    %c0_i32_0 = arith.constant 0 : i32
    %c0_i32_1 = arith.constant 0 : i32
    return %c0_i32, %c0_i32_0 : i32, i32
  }
  func.func @transform_11(%arg0: i32) -> (i32, i32, i32) {
    %c0_i32 = arith.constant 0 : i32
    %c0_i32_0 = arith.constant 0 : i32
    %c0_i32_1 = arith.constant 0 : i32
    return %arg0, %c0_i32, %c0_i32_0 : i32, i32, i32
  }
}

module attributes {stable_mosaic.version = 11 : i64} {
  func.func @_encoder_kernel(%arg0: i32, %arg1: memref<1x4x192xbf16, #tpu.memory_space<vmem>>, %arg2: memref<192x32xbf16, #tpu.memory_space<vmem>>, %arg3: memref<32x96xbf16, #tpu.memory_space<vmem>>, %arg4: memref<32x32xbf16, #tpu.memory_space<vmem>>, %arg5: memref<32x64xbf16, #tpu.memory_space<vmem>>, %arg6: memref<64x32xbf16, #tpu.memory_space<vmem>>, %arg7: memref<32x64xbf16, #tpu.memory_space<vmem>>, %arg8: memref<64x128xbf16, #tpu.memory_space<vmem>>, %arg9: memref<10x32xf32, #tpu.memory_space<vmem>>, %arg10: memref<4x128xf32, #tpu.memory_space<vmem>>, %arg11: memref<4x32xf32, #tpu.memory_space<vmem>>, %arg12: memref<1x1x128xf32, #tpu.memory_space<vmem>>, %arg13: memref<1x5x32xf32, #tpu.memory_space<vmem>>, %arg14: memref<1x5x32xbf16, #tpu.memory_space<vmem>>) attributes {dimension_semantics = [#tpu.dimension_semantics<parallel>], iteration_bounds = array<i64: 2>, scalar_prefetch = 0 : i64, scratch_operands = 2 : i64, tpu.core_type = #tpu.core_type<tc>, window_params = [{transform_indices = @transform_0, window_bounds = array<i64: 1, 4, 192>}, {pipeline_mode = #tpu.pipeline_mode<synchronous>, transform_indices = @transform_1, window_bounds = array<i64: 192, 32>}, {pipeline_mode = #tpu.pipeline_mode<synchronous>, transform_indices = @transform_2, window_bounds = array<i64: 32, 96>}, {pipeline_mode = #tpu.pipeline_mode<synchronous>, transform_indices = @transform_3, window_bounds = array<i64: 32, 32>}, {pipeline_mode = #tpu.pipeline_mode<synchronous>, transform_indices = @transform_4, window_bounds = array<i64: 32, 64>}, {pipeline_mode = #tpu.pipeline_mode<synchronous>, transform_indices = @transform_5, window_bounds = array<i64: 64, 32>}, {pipeline_mode = #tpu.pipeline_mode<synchronous>, transform_indices = @transform_6, window_bounds = array<i64: 32, 64>}, {pipeline_mode = #tpu.pipeline_mode<synchronous>, transform_indices = @transform_7, window_bounds = array<i64: 64, 128>}, {pipeline_mode = #tpu.pipeline_mode<synchronous>, transform_indices = @transform_8, window_bounds = array<i64: 10, 32>}, {pipeline_mode = #tpu.pipeline_mode<synchronous>, transform_indices = @transform_9, window_bounds = array<i64: 4, 128>}, {pipeline_mode = #tpu.pipeline_mode<synchronous>, transform_indices = @transform_10, window_bounds = array<i64: 4, 32>}, {transform_indices = @transform_11, window_bounds = array<i64: 1, 1, 128>}]} {
    %c0 = arith.constant 0 : index
    %c0_0 = arith.constant 0 : index
    %0 = vector.load %arg9[%c0, %c0_0] : memref<10x32xf32, #tpu.memory_space<vmem>>, vector<1x32xf32>
    %c1 = arith.constant 1 : index
    %c0_1 = arith.constant 0 : index
    %1 = vector.load %arg9[%c1, %c0_1] : memref<10x32xf32, #tpu.memory_space<vmem>>, vector<1x32xf32>
    %c2 = arith.constant 2 : index
    %c0_2 = arith.constant 0 : index
    %2 = vector.load %arg9[%c2, %c0_2] : memref<10x32xf32, #tpu.memory_space<vmem>>, vector<1x32xf32>
    %c3 = arith.constant 3 : index
    %c0_3 = arith.constant 0 : index
    %3 = vector.load %arg9[%c3, %c0_3] : memref<10x32xf32, #tpu.memory_space<vmem>>, vector<1x32xf32>
    %c4 = arith.constant 4 : index
    %c0_4 = arith.constant 0 : index
    %4 = vector.load %arg9[%c4, %c0_4] : memref<10x32xf32, #tpu.memory_space<vmem>>, vector<1x32xf32>
    %c5 = arith.constant 5 : index
    %c0_5 = arith.constant 0 : index
    %5 = vector.load %arg9[%c5, %c0_5] : memref<10x32xf32, #tpu.memory_space<vmem>>, vector<1x32xf32>
    %c6 = arith.constant 6 : index
    %c0_6 = arith.constant 0 : index
    %6 = vector.load %arg9[%c6, %c0_6] : memref<10x32xf32, #tpu.memory_space<vmem>>, vector<1x32xf32>
    %c7 = arith.constant 7 : index
    %c0_7 = arith.constant 0 : index
    %7 = vector.load %arg9[%c7, %c0_7] : memref<10x32xf32, #tpu.memory_space<vmem>>, vector<1x32xf32>
    %c8 = arith.constant 8 : index
    %c0_8 = arith.constant 0 : index
    %8 = vector.load %arg9[%c8, %c0_8] : memref<10x32xf32, #tpu.memory_space<vmem>>, vector<1x32xf32>
    %c9 = arith.constant 9 : index
    %c0_9 = arith.constant 0 : index
    %9 = vector.load %arg9[%c9, %c0_9] : memref<10x32xf32, #tpu.memory_space<vmem>>, vector<1x32xf32>
    %c0_10 = arith.constant 0 : index
    %c0_11 = arith.constant 0 : index
    %10 = vector.load %arg10[%c0_10, %c0_11] : memref<4x128xf32, #tpu.memory_space<vmem>>, vector<1x96xf32>
    %c1_12 = arith.constant 1 : index
    %c0_13 = arith.constant 0 : index
    %11 = vector.load %arg10[%c1_12, %c0_13] : memref<4x128xf32, #tpu.memory_space<vmem>>, vector<1x64xf32>
    %c2_14 = arith.constant 2 : index
    %c0_15 = arith.constant 0 : index
    %12 = vector.load %arg10[%c2_14, %c0_15] : memref<4x128xf32, #tpu.memory_space<vmem>>, vector<1x64xf32>
    %c3_16 = arith.constant 3 : index
    %c0_17 = arith.constant 0 : index
    %13 = vector.load %arg10[%c3_16, %c0_17] : memref<4x128xf32, #tpu.memory_space<vmem>>, vector<1x128xf32>
    %c0_18 = arith.constant 0 : index
    %c0_19 = arith.constant 0 : index
    %c0_20 = arith.constant 0 : index
    %14 = vector.load %arg1[%c0_18, %c0_19, %c0_20] : memref<1x4x192xbf16, #tpu.memory_space<vmem>>, vector<1x4x192xbf16>
    %15 = vector.shape_cast %14 : vector<1x4x192xbf16> to vector<4x192xbf16>
    %c0_21 = arith.constant 0 : index
    %c0_22 = arith.constant 0 : index
    %16 = vector.load %arg2[%c0_21, %c0_22] : memref<192x32xbf16, #tpu.memory_space<vmem>>, vector<192x32xbf16>
    %cst = arith.constant dense<0.000000e+00> : vector<4x32xf32>
    %17 = tpu.matmul %15, %16, %cst {dimension_numbers = #tpu.dot_dimension_numbers<[1], [0], [0], [1], [0, 0, 1, 1], [], []>} : vector<4x192xbf16>, vector<192x32xbf16>, vector<4x32xf32> -> vector<4x32xf32>
    %18 = vector.shape_cast %1 : vector<1x32xf32> to vector<1x1x32xf32>
    %c0_23 = arith.constant 0 : index
    %c0_24 = arith.constant 0 : index
    %c0_25 = arith.constant 0 : index
    %19 = vector.load %arg13[%c0_23, %c0_24, %c0_25] : memref<1x5x32xf32, #tpu.memory_space<vmem>>, vector<1x1x32xf32>
    tpu.vector_store %arg13[%c0_23, %c0_24, %c0_25], %18 {strides = array<i32>} : memref<1x5x32xf32, #tpu.memory_space<vmem>>, vector<1x1x32xf32>,
    %20 = vector.shape_cast %17 : vector<4x32xf32> to vector<1x4x32xf32>
    %21 = vector.shape_cast %0 : vector<1x32xf32> to vector<1x1x32xf32>
    %22 = vector.broadcast %21 : vector<1x1x32xf32> to vector<1x4x32xf32>
    %23 = arith.addf %20, %22 : vector<1x4x32xf32>
    %c0_26 = arith.constant 0 : index
    %c0_27 = arith.constant 0 : index
    %24 = vector.load %arg11[%c0_26, %c0_27] : memref<4x32xf32, #tpu.memory_space<vmem>>, vector<4x32xf32>
    %25 = vector.shape_cast %24 : vector<4x32xf32> to vector<1x4x32xf32>
    %26 = arith.addf %23, %25 : vector<1x4x32xf32>
    %c0_28 = arith.constant 0 : index
    %c1_29 = arith.constant 1 : index
    %c0_30 = arith.constant 0 : index
    %27 = vector.load %arg13[%c0_28, %c1_29, %c0_30] : memref<1x5x32xf32, #tpu.memory_space<vmem>>, vector<1x4x32xf32>
    tpu.vector_store %arg13[%c0_28, %c1_29, %c0_30], %26 {strides = array<i32>} : memref<1x5x32xf32, #tpu.memory_space<vmem>>, vector<1x4x32xf32>,
    %c0_31 = arith.constant 0 : index
    %c0_32 = arith.constant 0 : index
    %c0_33 = arith.constant 0 : index
    %28 = vector.load %arg13[%c0_31, %c0_32, %c0_33] : memref<1x5x32xf32, #tpu.memory_space<vmem>>, vector<1x5x32xf32>
    %29 = vector.shape_cast %28 : vector<1x5x32xf32> to vector<5x32xf32>
    %cst_34 = arith.constant dense<0.000000e+00> : vector<5xf32>
    %30 = vector.multi_reduction <add>, %29, %cst_34 [1] : vector<5x32xf32> to vector<5xf32>
    %31 = vector.shape_cast %30 : vector<5xf32> to vector<5x1xf32>
    %cst_35 = arith.constant 3.200000e+01 : f32
    %32 = vector.broadcast %cst_35 : f32 to vector<5x1xf32>
    %33 = arith.divf %31, %32 : vector<5x1xf32>
    %34 = vector.broadcast %33 : vector<5x1xf32> to vector<5x32xf32>
    %35 = arith.subf %29, %34 : vector<5x32xf32>
    %36 = vector.broadcast %33 : vector<5x1xf32> to vector<5x32xf32>
    %37 = arith.subf %29, %36 : vector<5x32xf32>
    %38 = arith.mulf %35, %37 : vector<5x32xf32>
    %cst_36 = arith.constant dense<0.000000e+00> : vector<5xf32>
    %39 = vector.multi_reduction <add>, %38, %cst_36 [1] : vector<5x32xf32> to vector<5xf32>
    %40 = vector.shape_cast %39 : vector<5xf32> to vector<5x1xf32>
    %cst_37 = arith.constant 3.200000e+01 : f32
    %41 = vector.broadcast %cst_37 : f32 to vector<5x1xf32>
    %42 = arith.divf %40, %41 : vector<5x1xf32>
    %43 = vector.broadcast %33 : vector<5x1xf32> to vector<5x32xf32>
    %44 = arith.subf %29, %43 : vector<5x32xf32>
    %cst_38 = arith.constant 9.99999974E-6 : f32
    %45 = vector.broadcast %cst_38 : f32 to vector<5x1xf32>
    %46 = arith.addf %42, %45 : vector<5x1xf32>
    %47 = math.rsqrt %46 : vector<5x1xf32>
    %48 = vector.broadcast %47 : vector<5x1xf32> to vector<5x32xf32>
    %49 = arith.mulf %44, %48 : vector<5x32xf32>
    %50 = vector.broadcast %2 : vector<1x32xf32> to vector<5x32xf32>
    %51 = arith.mulf %49, %50 : vector<5x32xf32>
    %52 = vector.broadcast %3 : vector<1x32xf32> to vector<5x32xf32>
    %53 = arith.addf %51, %52 : vector<5x32xf32>
    %54 = arith.truncf %53 : vector<5x32xf32> to vector<5x32xbf16>
    %c0_39 = arith.constant 0 : index
    %c0_40 = arith.constant 0 : index
    %55 = vector.load %arg3[%c0_39, %c0_40] : memref<32x96xbf16, #tpu.memory_space<vmem>>, vector<32x96xbf16>
    %cst_41 = arith.constant dense<0.000000e+00> : vector<5x96xf32>
    %56 = tpu.matmul %54, %55, %cst_41 {dimension_numbers = #tpu.dot_dimension_numbers<[1], [0], [0], [1], [0, 0, 1, 1], [], []>} : vector<5x32xbf16>, vector<32x96xbf16>, vector<5x96xf32> -> vector<5x96xf32>
    %57 = vector.broadcast %10 : vector<1x96xf32> to vector<5x96xf32>
    %58 = arith.addf %56, %57 : vector<5x96xf32>
    %59 = arith.truncf %58 : vector<5x96xf32> to vector<5x96xbf16>
    %60 = vector.shape_cast %59 : vector<5x96xbf16> to vector<1x5x96xbf16>
    %61 = vector.extract_strided_slice %60 {offsets = [0, 0, 0], sizes = [1, 5, 8], strides = [1, 1, 1]} : vector<1x5x96xbf16> to vector<1x5x8xbf16>
    %62 = vector.extract_strided_slice %60 {offsets = [0, 0, 32], sizes = [1, 5, 8], strides = [1, 1, 1]} : vector<1x5x96xbf16> to vector<1x5x8xbf16>
    %63 = vector.extract_strided_slice %60 {offsets = [0, 0, 64], sizes = [1, 5, 8], strides = [1, 1, 1]} : vector<1x5x96xbf16> to vector<1x5x8xbf16>
    "tpu.trace_start"() <{level = 10 : i32, message = "bqd,bkd->bqk"}> : () -> ()
    %cst_42 = arith.constant dense<0.000000e+00> : vector<1x5x5xf32>
    %64 = tpu.matmul %61, %62, %cst_42 {dimension_numbers = #tpu.dot_dimension_numbers<[2], [2], [1], [1], [0, 0, 0, 1, 1, 1], [0], [0]>} : vector<1x5x8xbf16>, vector<1x5x8xbf16>, vector<1x5x5xf32> -> vector<1x5x5xf32>
    "tpu.trace_stop"() : () -> ()
    %cst_43 = arith.constant dense<0xFF800000> : vector<1x5xf32>
    %65 = vector.multi_reduction <maximumf>, %64, %cst_43 [2] : vector<1x5x5xf32> to vector<1x5xf32>
    %66 = vector.shape_cast %65 : vector<1x5xf32> to vector<1x5x1xf32>
    %67 = vector.broadcast %66 : vector<1x5x1xf32> to vector<1x5x5xf32>
    %68 = arith.subf %64, %67 : vector<1x5x5xf32>
    %69 = math.exp %68 : vector<1x5x5xf32>
    %cst_44 = arith.constant dense<0.000000e+00> : vector<1x5xf32>
    %70 = vector.multi_reduction <add>, %69, %cst_44 [2] : vector<1x5x5xf32> to vector<1x5xf32>
    %71 = vector.shape_cast %70 : vector<1x5xf32> to vector<1x5x1xf32>
    %72 = tpu.reciprocal %71 {approx = true} : vector<1x5x1xf32> -> vector<1x5x1xf32>
    %73 = vector.broadcast %72 : vector<1x5x1xf32> to vector<1x5x5xf32>
    %74 = arith.mulf %69, %73 : vector<1x5x5xf32>
    %75 = arith.truncf %74 : vector<1x5x5xf32> to vector<1x5x5xbf16>
    "tpu.trace_start"() <{level = 10 : i32, message = "bqk,bkd->bqd"}> : () -> ()
    %cst_45 = arith.constant dense<0.000000e+00> : vector<1x5x8xf32>
    %76 = tpu.matmul %75, %63, %cst_45 {dimension_numbers = #tpu.dot_dimension_numbers<[2], [1], [1], [2], [0, 0, 0, 1, 1, 2], [0], [0]>} : vector<1x5x5xbf16>, vector<1x5x8xbf16>, vector<1x5x8xf32> -> vector<1x5x8xf32>
    "tpu.trace_stop"() : () -> ()
    %77 = arith.truncf %76 : vector<1x5x8xf32> to vector<1x5x8xbf16>
    %c0_46 = arith.constant 0 : index
    %c0_47 = arith.constant 0 : index
    %c0_48 = arith.constant 0 : index
    %78 = vector.load %arg14[%c0_46, %c0_47, %c0_48] : memref<1x5x32xbf16, #tpu.memory_space<vmem>>, vector<1x5x8xbf16>
    tpu.vector_store %arg14[%c0_46, %c0_47, %c0_48], %77 {strides = array<i32>} : memref<1x5x32xbf16, #tpu.memory_space<vmem>>, vector<1x5x8xbf16>,
    %79 = vector.extract_strided_slice %60 {offsets = [0, 0, 8], sizes = [1, 5, 8], strides = [1, 1, 1]} : vector<1x5x96xbf16> to vector<1x5x8xbf16>
    %80 = vector.extract_strided_slice %60 {offsets = [0, 0, 40], sizes = [1, 5, 8], strides = [1, 1, 1]} : vector<1x5x96xbf16> to vector<1x5x8xbf16>
    %81 = vector.extract_strided_slice %60 {offsets = [0, 0, 72], sizes = [1, 5, 8], strides = [1, 1, 1]} : vector<1x5x96xbf16> to vector<1x5x8xbf16>
    "tpu.trace_start"() <{level = 10 : i32, message = "bqd,bkd->bqk"}> : () -> ()
    %cst_49 = arith.constant dense<0.000000e+00> : vector<1x5x5xf32>
    %82 = tpu.matmul %79, %80, %cst_49 {dimension_numbers = #tpu.dot_dimension_numbers<[2], [2], [1], [1], [0, 0, 0, 1, 1, 1], [0], [0]>} : vector<1x5x8xbf16>, vector<1x5x8xbf16>, vector<1x5x5xf32> -> vector<1x5x5xf32>
    "tpu.trace_stop"() : () -> ()
    %cst_50 = arith.constant dense<0xFF800000> : vector<1x5xf32>
    %83 = vector.multi_reduction <maximumf>, %82, %cst_50 [2] : vector<1x5x5xf32> to vector<1x5xf32>
    %84 = vector.shape_cast %83 : vector<1x5xf32> to vector<1x5x1xf32>
    %85 = vector.broadcast %84 : vector<1x5x1xf32> to vector<1x5x5xf32>
    %86 = arith.subf %82, %85 : vector<1x5x5xf32>
    %87 = math.exp %86 : vector<1x5x5xf32>
    %cst_51 = arith.constant dense<0.000000e+00> : vector<1x5xf32>
    %88 = vector.multi_reduction <add>, %87, %cst_51 [2] : vector<1x5x5xf32> to vector<1x5xf32>
    %89 = vector.shape_cast %88 : vector<1x5xf32> to vector<1x5x1xf32>
    %90 = tpu.reciprocal %89 {approx = true} : vector<1x5x1xf32> -> vector<1x5x1xf32>
    %91 = vector.broadcast %90 : vector<1x5x1xf32> to vector<1x5x5xf32>
    %92 = arith.mulf %87, %91 : vector<1x5x5xf32>
    %93 = arith.truncf %92 : vector<1x5x5xf32> to vector<1x5x5xbf16>
    "tpu.trace_start"() <{level = 10 : i32, message = "bqk,bkd->bqd"}> : () -> ()
    %cst_52 = arith.constant dense<0.000000e+00> : vector<1x5x8xf32>
    %94 = tpu.matmul %93, %81, %cst_52 {dimension_numbers = #tpu.dot_dimension_numbers<[2], [1], [1], [2], [0, 0, 0, 1, 1, 2], [0], [0]>} : vector<1x5x5xbf16>, vector<1x5x8xbf16>, vector<1x5x8xf32> -> vector<1x5x8xf32>
    "tpu.trace_stop"() : () -> ()
    %95 = arith.truncf %94 : vector<1x5x8xf32> to vector<1x5x8xbf16>
    %c0_53 = arith.constant 0 : index
    %c0_54 = arith.constant 0 : index
    %c8_55 = arith.constant 8 : index
    %96 = vector.load %arg14[%c0_53, %c0_54, %c8_55] : memref<1x5x32xbf16, #tpu.memory_space<vmem>>, vector<1x5x8xbf16>
    tpu.vector_store %arg14[%c0_53, %c0_54, %c8_55], %95 {strides = array<i32>} : memref<1x5x32xbf16, #tpu.memory_space<vmem>>, vector<1x5x8xbf16>,
    %97 = vector.extract_strided_slice %60 {offsets = [0, 0, 16], sizes = [1, 5, 8], strides = [1, 1, 1]} : vector<1x5x96xbf16> to vector<1x5x8xbf16>
    %98 = vector.extract_strided_slice %60 {offsets = [0, 0, 48], sizes = [1, 5, 8], strides = [1, 1, 1]} : vector<1x5x96xbf16> to vector<1x5x8xbf16>
    %99 = vector.extract_strided_slice %60 {offsets = [0, 0, 80], sizes = [1, 5, 8], strides = [1, 1, 1]} : vector<1x5x96xbf16> to vector<1x5x8xbf16>
    "tpu.trace_start"() <{level = 10 : i32, message = "bqd,bkd->bqk"}> : () -> ()
    %cst_56 = arith.constant dense<0.000000e+00> : vector<1x5x5xf32>
    %100 = tpu.matmul %97, %98, %cst_56 {dimension_numbers = #tpu.dot_dimension_numbers<[2], [2], [1], [1], [0, 0, 0, 1, 1, 1], [0], [0]>} : vector<1x5x8xbf16>, vector<1x5x8xbf16>, vector<1x5x5xf32> -> vector<1x5x5xf32>
    "tpu.trace_stop"() : () -> ()
    %cst_57 = arith.constant dense<0xFF800000> : vector<1x5xf32>
    %101 = vector.multi_reduction <maximumf>, %100, %cst_57 [2] : vector<1x5x5xf32> to vector<1x5xf32>
    %102 = vector.shape_cast %101 : vector<1x5xf32> to vector<1x5x1xf32>
    %103 = vector.broadcast %102 : vector<1x5x1xf32> to vector<1x5x5xf32>
    %104 = arith.subf %100, %103 : vector<1x5x5xf32>
    %105 = math.exp %104 : vector<1x5x5xf32>
    %cst_58 = arith.constant dense<0.000000e+00> : vector<1x5xf32>
    %106 = vector.multi_reduction <add>, %105, %cst_58 [2] : vector<1x5x5xf32> to vector<1x5xf32>
    %107 = vector.shape_cast %106 : vector<1x5xf32> to vector<1x5x1xf32>
    %108 = tpu.reciprocal %107 {approx = true} : vector<1x5x1xf32> -> vector<1x5x1xf32>
    %109 = vector.broadcast %108 : vector<1x5x1xf32> to vector<1x5x5xf32>
    %110 = arith.mulf %105, %109 : vector<1x5x5xf32>
    %111 = arith.truncf %110 : vector<1x5x5xf32> to vector<1x5x5xbf16>
    "tpu.trace_start"() <{level = 10 : i32, message = "bqk,bkd->bqd"}> : () -> ()
    %cst_59 = arith.constant dense<0.000000e+00> : vector<1x5x8xf32>
    %112 = tpu.matmul %111, %99, %cst_59 {dimension_numbers = #tpu.dot_dimension_numbers<[2], [1], [1], [2], [0, 0, 0, 1, 1, 2], [0], [0]>} : vector<1x5x5xbf16>, vector<1x5x8xbf16>, vector<1x5x8xf32> -> vector<1x5x8xf32>
    "tpu.trace_stop"() : () -> ()
    %113 = arith.truncf %112 : vector<1x5x8xf32> to vector<1x5x8xbf16>
    %c0_60 = arith.constant 0 : index
    %c0_61 = arith.constant 0 : index
    %c16 = arith.constant 16 : index
    %114 = vector.load %arg14[%c0_60, %c0_61, %c16] : memref<1x5x32xbf16, #tpu.memory_space<vmem>>, vector<1x5x8xbf16>
    tpu.vector_store %arg14[%c0_60, %c0_61, %c16], %113 {strides = array<i32>} : memref<1x5x32xbf16, #tpu.memory_space<vmem>>, vector<1x5x8xbf16>,
    %115 = vector.extract_strided_slice %60 {offsets = [0, 0, 24], sizes = [1, 5, 8], strides = [1, 1, 1]} : vector<1x5x96xbf16> to vector<1x5x8xbf16>
    %116 = vector.extract_strided_slice %60 {offsets = [0, 0, 56], sizes = [1, 5, 8], strides = [1, 1, 1]} : vector<1x5x96xbf16> to vector<1x5x8xbf16>
    %117 = vector.extract_strided_slice %60 {offsets = [0, 0, 88], sizes = [1, 5, 8], strides = [1, 1, 1]} : vector<1x5x96xbf16> to vector<1x5x8xbf16>
    "tpu.trace_start"() <{level = 10 : i32, message = "bqd,bkd->bqk"}> : () -> ()
    %cst_62 = arith.constant dense<0.000000e+00> : vector<1x5x5xf32>
    %118 = tpu.matmul %115, %116, %cst_62 {dimension_numbers = #tpu.dot_dimension_numbers<[2], [2], [1], [1], [0, 0, 0, 1, 1, 1], [0], [0]>} : vector<1x5x8xbf16>, vector<1x5x8xbf16>, vector<1x5x5xf32> -> vector<1x5x5xf32>
    "tpu.trace_stop"() : () -> ()
    %cst_63 = arith.constant dense<0xFF800000> : vector<1x5xf32>
    %119 = vector.multi_reduction <maximumf>, %118, %cst_63 [2] : vector<1x5x5xf32> to vector<1x5xf32>
    %120 = vector.shape_cast %119 : vector<1x5xf32> to vector<1x5x1xf32>
    %121 = vector.broadcast %120 : vector<1x5x1xf32> to vector<1x5x5xf32>
    %122 = arith.subf %118, %121 : vector<1x5x5xf32>
    %123 = math.exp %122 : vector<1x5x5xf32>
    %cst_64 = arith.constant dense<0.000000e+00> : vector<1x5xf32>
    %124 = vector.multi_reduction <add>, %123, %cst_64 [2] : vector<1x5x5xf32> to vector<1x5xf32>
    %125 = vector.shape_cast %124 : vector<1x5xf32> to vector<1x5x1xf32>
    %126 = tpu.reciprocal %125 {approx = true} : vector<1x5x1xf32> -> vector<1x5x1xf32>
    %127 = vector.broadcast %126 : vector<1x5x1xf32> to vector<1x5x5xf32>
    %128 = arith.mulf %123, %127 : vector<1x5x5xf32>
    %129 = arith.truncf %128 : vector<1x5x5xf32> to vector<1x5x5xbf16>
    "tpu.trace_start"() <{level = 10 : i32, message = "bqk,bkd->bqd"}> : () -> ()
    %cst_65 = arith.constant dense<0.000000e+00> : vector<1x5x8xf32>
    %130 = tpu.matmul %129, %117, %cst_65 {dimension_numbers = #tpu.dot_dimension_numbers<[2], [1], [1], [2], [0, 0, 0, 1, 1, 2], [0], [0]>} : vector<1x5x5xbf16>, vector<1x5x8xbf16>, vector<1x5x8xf32> -> vector<1x5x8xf32>
    "tpu.trace_stop"() : () -> ()
    %131 = arith.truncf %130 : vector<1x5x8xf32> to vector<1x5x8xbf16>
    %c0_66 = arith.constant 0 : index
    %c0_67 = arith.constant 0 : index
    %c24 = arith.constant 24 : index
    %132 = vector.load %arg14[%c0_66, %c0_67, %c24] : memref<1x5x32xbf16, #tpu.memory_space<vmem>>, vector<1x5x8xbf16>
    tpu.vector_store %arg14[%c0_66, %c0_67, %c24], %131 {strides = array<i32>} : memref<1x5x32xbf16, #tpu.memory_space<vmem>>, vector<1x5x8xbf16>,
    %c0_68 = arith.constant 0 : index
    %c0_69 = arith.constant 0 : index
    %c0_70 = arith.constant 0 : index
    %133 = vector.load %arg14[%c0_68, %c0_69, %c0_70] : memref<1x5x32xbf16, #tpu.memory_space<vmem>>, vector<1x5x32xbf16>
    %134 = vector.shape_cast %133 : vector<1x5x32xbf16> to vector<5x32xbf16>
    %c0_71 = arith.constant 0 : index
    %c0_72 = arith.constant 0 : index
    %135 = vector.load %arg4[%c0_71, %c0_72] : memref<32x32xbf16, #tpu.memory_space<vmem>>, vector<32x32xbf16>
    %cst_73 = arith.constant dense<0.000000e+00> : vector<5x32xf32>
    %136 = tpu.matmul %134, %135, %cst_73 {dimension_numbers = #tpu.dot_dimension_numbers<[1], [0], [0], [1], [0, 0, 1, 1], [], []>} : vector<5x32xbf16>, vector<32x32xbf16>, vector<5x32xf32> -> vector<5x32xf32>
    %137 = vector.broadcast %4 : vector<1x32xf32> to vector<5x32xf32>
    %138 = arith.addf %136, %137 : vector<5x32xf32>
    %139 = arith.addf %29, %138 : vector<5x32xf32>
    %cst_74 = arith.constant dense<0.000000e+00> : vector<5xf32>
    %140 = vector.multi_reduction <add>, %139, %cst_74 [1] : vector<5x32xf32> to vector<5xf32>
    %141 = vector.shape_cast %140 : vector<5xf32> to vector<5x1xf32>
    %cst_75 = arith.constant 3.200000e+01 : f32
    %142 = vector.broadcast %cst_75 : f32 to vector<5x1xf32>
    %143 = arith.divf %141, %142 : vector<5x1xf32>
    %144 = vector.broadcast %143 : vector<5x1xf32> to vector<5x32xf32>
    %145 = arith.subf %139, %144 : vector<5x32xf32>
    %146 = vector.broadcast %143 : vector<5x1xf32> to vector<5x32xf32>
    %147 = arith.subf %139, %146 : vector<5x32xf32>
    %148 = arith.mulf %145, %147 : vector<5x32xf32>
    %cst_76 = arith.constant dense<0.000000e+00> : vector<5xf32>
    %149 = vector.multi_reduction <add>, %148, %cst_76 [1] : vector<5x32xf32> to vector<5xf32>
    %150 = vector.shape_cast %149 : vector<5xf32> to vector<5x1xf32>
    %cst_77 = arith.constant 3.200000e+01 : f32
    %151 = vector.broadcast %cst_77 : f32 to vector<5x1xf32>
    %152 = arith.divf %150, %151 : vector<5x1xf32>
    %153 = vector.broadcast %143 : vector<5x1xf32> to vector<5x32xf32>
    %154 = arith.subf %139, %153 : vector<5x32xf32>
    %cst_78 = arith.constant 9.99999974E-6 : f32
    %155 = vector.broadcast %cst_78 : f32 to vector<5x1xf32>
    %156 = arith.addf %152, %155 : vector<5x1xf32>
    %157 = math.rsqrt %156 : vector<5x1xf32>
    %158 = vector.broadcast %157 : vector<5x1xf32> to vector<5x32xf32>
    %159 = arith.mulf %154, %158 : vector<5x32xf32>
    %160 = vector.broadcast %5 : vector<1x32xf32> to vector<5x32xf32>
    %161 = arith.mulf %159, %160 : vector<5x32xf32>
    %162 = vector.broadcast %6 : vector<1x32xf32> to vector<5x32xf32>
    %163 = arith.addf %161, %162 : vector<5x32xf32>
    %164 = arith.truncf %163 : vector<5x32xf32> to vector<5x32xbf16>
    %c0_79 = arith.constant 0 : index
    %c0_80 = arith.constant 0 : index
    %165 = vector.load %arg5[%c0_79, %c0_80] : memref<32x64xbf16, #tpu.memory_space<vmem>>, vector<32x64xbf16>
    %cst_81 = arith.constant dense<0.000000e+00> : vector<5x64xf32>
    %166 = tpu.matmul %164, %165, %cst_81 {dimension_numbers = #tpu.dot_dimension_numbers<[1], [0], [0], [1], [0, 0, 1, 1], [], []>} : vector<5x32xbf16>, vector<32x64xbf16>, vector<5x64xf32> -> vector<5x64xf32>
    %167 = vector.broadcast %11 : vector<1x64xf32> to vector<5x64xf32>
    %168 = arith.addf %166, %167 : vector<5x64xf32>
    %169 = arith.mulf %168, %168 : vector<5x64xf32>
    %170 = arith.mulf %168, %169 : vector<5x64xf32>
    %cst_82 = arith.constant 4.471500e-02 : f32
    %171 = vector.broadcast %cst_82 : f32 to vector<5x64xf32>
    %172 = arith.mulf %171, %170 : vector<5x64xf32>
    %173 = arith.addf %168, %172 : vector<5x64xf32>
    %cst_83 = arith.constant 0.797884583 : f32
    %174 = vector.broadcast %cst_83 : f32 to vector<5x64xf32>
    %175 = arith.mulf %174, %173 : vector<5x64xf32>
    %176 = math.tanh %175 : vector<5x64xf32>
    %cst_84 = arith.constant 1.000000e+00 : f32
    %177 = vector.broadcast %cst_84 : f32 to vector<5x64xf32>
    %178 = arith.addf %177, %176 : vector<5x64xf32>
    %cst_85 = arith.constant 5.000000e-01 : f32
    %179 = vector.broadcast %cst_85 : f32 to vector<5x64xf32>
    %180 = arith.mulf %179, %178 : vector<5x64xf32>
    %181 = arith.mulf %168, %180 : vector<5x64xf32>
    %182 = arith.truncf %181 : vector<5x64xf32> to vector<5x64xbf16>
    %c0_86 = arith.constant 0 : index
    %c0_87 = arith.constant 0 : index
    %183 = vector.load %arg6[%c0_86, %c0_87] : memref<64x32xbf16, #tpu.memory_space<vmem>>, vector<64x32xbf16>
    %cst_88 = arith.constant dense<0.000000e+00> : vector<5x32xf32>
    %184 = tpu.matmul %182, %183, %cst_88 {dimension_numbers = #tpu.dot_dimension_numbers<[1], [0], [0], [1], [0, 0, 1, 1], [], []>} : vector<5x64xbf16>, vector<64x32xbf16>, vector<5x32xf32> -> vector<5x32xf32>
    %185 = vector.broadcast %7 : vector<1x32xf32> to vector<5x32xf32>
    %186 = arith.addf %184, %185 : vector<5x32xf32>
    %187 = arith.addf %139, %186 : vector<5x32xf32>
    %188 = vector.shape_cast %187 : vector<5x32xf32> to vector<1x5x32xf32>
    %189 = vector.extract_strided_slice %188 {offsets = [0, 0, 0], sizes = [1, 1, 32], strides = [1, 1, 1]} : vector<1x5x32xf32> to vector<1x1x32xf32>
    %190 = vector.shape_cast %189 : vector<1x1x32xf32> to vector<1x32xf32>
    %cst_89 = arith.constant dense<0.000000e+00> : vector<1xf32>
    %191 = vector.multi_reduction <add>, %190, %cst_89 [1] : vector<1x32xf32> to vector<1xf32>
    %192 = vector.shape_cast %191 : vector<1xf32> to vector<1x1xf32>
    %cst_90 = arith.constant 3.200000e+01 : f32
    %193 = vector.broadcast %cst_90 : f32 to vector<1x1xf32>
    %194 = arith.divf %192, %193 : vector<1x1xf32>
    %195 = vector.broadcast %194 : vector<1x1xf32> to vector<1x32xf32>
    %196 = arith.subf %190, %195 : vector<1x32xf32>
    %197 = vector.broadcast %194 : vector<1x1xf32> to vector<1x32xf32>
    %198 = arith.subf %190, %197 : vector<1x32xf32>
    %199 = arith.mulf %196, %198 : vector<1x32xf32>
    %cst_91 = arith.constant dense<0.000000e+00> : vector<1xf32>
    %200 = vector.multi_reduction <add>, %199, %cst_91 [1] : vector<1x32xf32> to vector<1xf32>
    %201 = vector.shape_cast %200 : vector<1xf32> to vector<1x1xf32>
    %cst_92 = arith.constant 3.200000e+01 : f32
    %202 = vector.broadcast %cst_92 : f32 to vector<1x1xf32>
    %203 = arith.divf %201, %202 : vector<1x1xf32>
    %204 = vector.broadcast %194 : vector<1x1xf32> to vector<1x32xf32>
    %205 = arith.subf %190, %204 : vector<1x32xf32>
    %cst_93 = arith.constant 9.99999974E-6 : f32
    %206 = vector.broadcast %cst_93 : f32 to vector<1x1xf32>
    %207 = arith.addf %203, %206 : vector<1x1xf32>
    %208 = math.rsqrt %207 : vector<1x1xf32>
    %209 = vector.broadcast %208 : vector<1x1xf32> to vector<1x32xf32>
    %210 = arith.mulf %205, %209 : vector<1x32xf32>
    %211 = arith.mulf %210, %8 : vector<1x32xf32>
    %212 = arith.addf %211, %9 : vector<1x32xf32>
    %213 = arith.truncf %212 : vector<1x32xf32> to vector<1x32xbf16>
    %c0_94 = arith.constant 0 : index
    %c0_95 = arith.constant 0 : index
    %214 = vector.load %arg7[%c0_94, %c0_95] : memref<32x64xbf16, #tpu.memory_space<vmem>>, vector<32x64xbf16>
    %cst_96 = arith.constant dense<0.000000e+00> : vector<1x64xf32>
    %215 = tpu.matmul %213, %214, %cst_96 {dimension_numbers = #tpu.dot_dimension_numbers<[1], [0], [0], [1], [0, 0, 1, 1], [], []>} : vector<1x32xbf16>, vector<32x64xbf16>, vector<1x64xf32> -> vector<1x64xf32>
    %216 = arith.addf %215, %12 : vector<1x64xf32>
    %cst_97 = arith.constant 0.000000e+00 : f32
    %217 = vector.broadcast %cst_97 : f32 to vector<1x64xf32>
    %218 = arith.maximumf %216, %217 : vector<1x64xf32>
    %219 = arith.truncf %218 : vector<1x64xf32> to vector<1x64xbf16>
    %c0_98 = arith.constant 0 : index
    %c0_99 = arith.constant 0 : index
    %220 = vector.load %arg8[%c0_98, %c0_99] : memref<64x128xbf16, #tpu.memory_space<vmem>>, vector<64x128xbf16>
    %cst_100 = arith.constant dense<0.000000e+00> : vector<1x128xf32>
    %221 = tpu.matmul %219, %220, %cst_100 {dimension_numbers = #tpu.dot_dimension_numbers<[1], [0], [0], [1], [0, 0, 1, 1], [], []>} : vector<1x64xbf16>, vector<64x128xbf16>, vector<1x128xf32> -> vector<1x128xf32>
    %222 = arith.addf %221, %13 : vector<1x128xf32>
    %223 = vector.shape_cast %222 : vector<1x128xf32> to vector<1x1x128xf32>
    %c0_101 = arith.constant 0 : index
    %c0_102 = arith.constant 0 : index
    %c0_103 = arith.constant 0 : index
    %224 = vector.load %arg12[%c0_101, %c0_102, %c0_103] : memref<1x1x128xf32, #tpu.memory_space<vmem>>, vector<1x1x128xf32>
    tpu.vector_store %arg12[%c0_101, %c0_102, %c0_103], %223 {strides = array<i32>} : memref<1x1x128xf32, #tpu.memory_space<vmem>>, vector<1x1x128xf32>,
    return
  }
  func.func @transform_0(%arg0: i32) -> (i32, i32, i32) {
    %c0_i32 = arith.constant 0 : i32
    %c0_i32_0 = arith.constant 0 : i32
    %c0_i32_1 = arith.constant 0 : i32
    return %arg0, %c0_i32, %c0_i32_0 : i32, i32, i32
  }
  func.func @transform_1(%arg0: i32) -> (i32, i32) {
    %c0_i32 = arith.constant 0 : i32
    %c0_i32_0 = arith.constant 0 : i32
    %c0_i32_1 = arith.constant 0 : i32
    return %c0_i32, %c0_i32_0 : i32, i32
  }
  func.func @transform_2(%arg0: i32) -> (i32, i32) {
    %c0_i32 = arith.constant 0 : i32
    %c0_i32_0 = arith.constant 0 : i32
    %c0_i32_1 = arith.constant 0 : i32
    return %c0_i32, %c0_i32_0 : i32, i32
  }
  func.func @transform_3(%arg0: i32) -> (i32, i32) {
    %c0_i32 = arith.constant 0 : i32
    %c0_i32_0 = arith.constant 0 : i32
    %c0_i32_1 = arith.constant 0 : i32
    return %c0_i32, %c0_i32_0 : i32, i32
  }
  func.func @transform_4(%arg0: i32) -> (i32, i32) {
    %c0_i32 = arith.constant 0 : i32
    %c0_i32_0 = arith.constant 0 : i32
    %c0_i32_1 = arith.constant 0 : i32
    return %c0_i32, %c0_i32_0 : i32, i32
  }
  func.func @transform_5(%arg0: i32) -> (i32, i32) {
    %c0_i32 = arith.constant 0 : i32
    %c0_i32_0 = arith.constant 0 : i32
    %c0_i32_1 = arith.constant 0 : i32
    return %c0_i32, %c0_i32_0 : i32, i32
  }
  func.func @transform_6(%arg0: i32) -> (i32, i32) {
    %c0_i32 = arith.constant 0 : i32
    %c0_i32_0 = arith.constant 0 : i32
    %c0_i32_1 = arith.constant 0 : i32
    return %c0_i32, %c0_i32_0 : i32, i32
  }
  func.func @transform_7(%arg0: i32) -> (i32, i32) {
    %c0_i32 = arith.constant 0 : i32
    %c0_i32_0 = arith.constant 0 : i32
    %c0_i32_1 = arith.constant 0 : i32
    return %c0_i32, %c0_i32_0 : i32, i32
  }
  func.func @transform_8(%arg0: i32) -> (i32, i32) {
    %c0_i32 = arith.constant 0 : i32
    %c0_i32_0 = arith.constant 0 : i32
    %c0_i32_1 = arith.constant 0 : i32
    return %c0_i32, %c0_i32_0 : i32, i32
  }
  func.func @transform_9(%arg0: i32) -> (i32, i32) {
    %c0_i32 = arith.constant 0 : i32
    %c0_i32_0 = arith.constant 0 : i32
    %c0_i32_1 = arith.constant 0 : i32
    return %c0_i32, %c0_i32_0 : i32, i32
  }
  func.func @transform_10(%arg0: i32) -> (i32, i32) {
    %c0_i32 = arith.constant 0 : i32
    %c0_i32_0 = arith.constant 0 : i32
    %c0_i32_1 = arith.constant 0 : i32
    return %c0_i32, %c0_i32_0 : i32, i32
  }
  func.func @transform_11(%arg0: i32) -> (i32, i32, i32) {
    %c0_i32 = arith.constant 0 : i32
    %c0_i32_0 = arith.constant 0 : i32
    %c0_i32_1 = arith.constant 0 : i32
    return %arg0, %c0_i32, %c0_i32_0 : i32, i32, i32
  }
}

</mosaic_0001>

<bundles_post_ra>
// kernel: tpu_custom_call.1
= control target key start
LH: loop header
LB: loop body
LE: loop exit
PB: predicated region body
PF: predicated region fallthrough
CT: control target
= control target key end

     0   :  { %16 = vsyncpa [#allocation5], 0  ;;  %s2414_s0 = inlined_call_operand.vmem [shape: bf16[2,4,192], index: 0, kind: input, shape index: {}]   ;;  %s2415_s1 = inlined_call_operand.vmem [shape: bf16[192,32], index: 1, kind: input, shape index: {}]   ;;  %s2416_s2 = inlined_call_operand.vmem [shape: bf16[32,96], index: 2, kind: input, shape index: {}]   ;;  %s2417_s3 = inlined_call_operand.vmem [shape: bf16[32,32], index: 3, kind: input, shape index: {}]   ;;  %s2418_s4 = inlined_call_operand.vmem [shape: bf16[32,64], index: 4, kind: input, shape index: {}]   ;;  %s2419_s5 = inlined_call_operand.vmem [shape: bf16[64,32], index: 5, kind: input, shape index: {}]   ;;  %s2420_s6 = inlined_call_operand.vmem [shape: bf16[32,64], index: 6, kind: input, shape index: {}]   ;;  %s2421_s7 = inlined_call_operand.vmem [shape: bf16[64,128], index: 7, kind: input, shape index: {}]   ;;  %s2422_s8 = inlined_call_operand.vmem [shape: f32[10,32], index: 8, kind: input, shape index: {}]   ;;  %s2423_s9 = inlined_call_operand.vmem [shape: f32[4,128], index: 9, kind: input, shape index: {}]   ;;  %s2424_s10 = inlined_call_operand.vmem [shape: f32[4,32], index: 10, kind: input, shape index: {}]   ;;  %s2425_s11 = inlined_call_operand.hbm [shape: f32[2,1,128], index: 11, kind: output, shape index: {}]  }
   0x1   :  { %18 = vsyncpa [#allocation5 + $0x1], 0  ;;  %s2066_s17 = smov 0   ;;  %s2068_s18 = smov 0  }
   0x2   :  { %s2070_s19 = smov 0   ;;  %s2072_s20 = smov 0  }
   0x3 LB: > { %s2087_s21 = sadd.s32 4294967295, %s1985_s20   ;;  %s1605_s22 = sadd.s32 4294967294, %s1985_s20   ;;  %s1985_s20 = sphi %s2072_s20, %s2433_s20   ;;  %s1981_s19 = sphi %s2070_s19, %s2432_s19   ;;  %s1977_s18 = sphi %s2068_s18, %s2431_s18   ;;  %s1973_s17 = sphi %s2066_s17, %s2430_s17  }
   0x4   : > { %s2091_s23 = sadd.s32 1, %s1985_s20   ;;  %s267_s24 = sadd.s32 1, %s1981_s19 }
   0x5   : > { %s264_s25 = ssub.s32 %s1985_s20, %s2091_s23  ;;  %p277_p0 = scmp.ne.s32.totalorder %s1981_s19, %s1977_s18 }
   0x6   : > { %p265_p1 = scmp.eq.s32.totalorder %s264_s25, 0  ;;  %p278_p2 = scmp.eq.s32.totalorder %s2087_s21, 1 }
   0x7   : > { %p283_p3 = scmp.ne.s32.totalorder %s1977_s18, %s1973_s17  ;;  %p284_p4 = scmp.eq.s32.totalorder %s1605_s22, 1 }
   0x8   : > { %s2102_s26 = scalar_select %p265_p1, %s1981_s19, %s267_s24  }
   0x9   : > { %p2104_p5 = por %p278_p2, %p277_p0  ;;  %p2108_p6 = por %p284_p4, %p283_p3 }
   0xa   : > { %2426 = sst [smem:[#allocation7_spill]] %s2102_s26  ;;  %p1608_p7 = scmp.ge.s32.totalorder %s1985_s20, 1 }
   0xb   : > { %p340_p8 = scmp.lt.s32.totalorder %s1985_s20, 3 }
   0xd   : > { %p341_p9 = pnand %p1608_p7, %p340_p8 }
   0xe   : > { %p379_p10 = scmp.lt.s32.totalorder (!%p341_p9), %s2087_s21, 1  ;;  %s1990_s30 = smov (!%p341_p9), 64  }
   0xf   : > { %344 = sbr.rel (%p341_p9) target bundleno = 4924 (0x133c), region = 64  ;;  %s1991_s12 = smov (!%p341_p9), 96  }
  0x10   : > { %s1993_s13 = smov (!%p341_p9), 88   ;;  %s1995_s15 = smov (!%p341_p9), 56  }
  0x11   : > { %s1996_s26 = smov (!%p341_p9), 80   ;;  %s1997_s16 = smov (!%p341_p9), 112  }
  0x12   : > { %s1999_s24 = smov (!%p341_p9), 72   ;;  %s2000_s25 = smov (!%p341_p9), 104  }
  0x14   : > { %v1873_v0 = vld [vmem:[%s2415_s1 + $0x38] sm:$0xff]   ;;  %v1987_v1 = vmov 0   ;;  %v1874_v2 = vld [vmem:[%s2415_s1 + $0x30] sm:$0xff]   ;;  %s380_s14 = scalar_select %p379_p10, %s2087_s21, 1  ;;  %v1875_v3 = vld [vmem:[%s2415_s1 + $0x28] sm:$0xff]   ;;  %vm506_vm0 = vcmask 523264  }
  0x15   : > { %510 = vmatprep.subr.bf16.mxu0 %v1987_v1  ;;  %v1876_v4 = vld [vmem:[%s2415_s1 + $0x20] sm:$0xff]   ;;  %v1877_v5 = vld [vmem:[%s2415_s1 + $0x18] sm:$0xff]   ;;  %v1878_v8 = vld [vmem:[%s2415_s1 + $0x10] sm:$0xff]   ;;  %vm550_vm1 = vcmask 253952   ;;  %vm559_vm2 = vcmask 257024   ;;  %vm562_vm3 = vcmask 258048  }
  0x16   : > { %511 = vmatpush1.bf16.msra.mxu0 %v1873_v0  ;;  %s1670_s22 = sshll.u32 %s380_s14, 2  ;;  %v1879_v9 = vld [vmem:[%s2415_s1 + $0x8] sm:$0xff]   ;;  %v1880_v10 = vld [vmem:[%s2415_s1] sm:$0xff]   ;;  %v1881_v11 = vld [vmem:[%s2415_s1 + $0x58] sm:$0xff]   ;;  %v1988_v32 = vmov 0.0   ;;  %vm1989_vm4 = vmmov 0  }
  0x17   : > { %512 = vmatprep.subr.bf16.mxu0 %v1987_v1  ;;  %s383_s29 = scalar_lea.vmem %s2414_s0, %s1670_s22  ;;  %v1882_v12 = vld [vmem:[%s2415_s1 + $0x50] sm:$0xff]   ;;  %v1883_v13 = vld [vmem:[%s2415_s1 + $0x48] sm:$0xff]   ;;  %v1884_v14 = vld [vmem:[%s2415_s1 + $0x40] sm:$0xff]   ;;  %1712 = vmatprep.subr.bf16.mxu1 %v1988_v32  ;;  %vm608_vm5 = vcmask 261120   ;;  %vm656_vm6 = vcmask 64512   ;;  %vm722_vm7 = vcmask 1041408  }
  0x18   : > { %v1611_v6 = vld.sshfl [vmem:[%s383_s29] sm:$0x33 pattern:$0x76325410]  ;;  %v1885_v31 = vld [vmem:[%s2416_s2 + $0x8] sm:$0xff]   ;;  %1716 = vmatprep.mubr.msk.bf16.mxu1 %vm1989_vm4, %v1988_v32  ;;  %vm723_vm8 = vcmask 1042432  }
  0x19   : > { %v432_v7 = vcombine.high %v1611_v6, %v1611_v6  ;;  %v386_v15 = vld [vmem:[%s2422_s8 + $0x1] sm:$0x1]  ;;  %v1625_v16 = vld [vmem:[%s2422_s8] ss:$0 sm:$0xff]  ;;  %1713 = vmatpush3.bf16.msra.mxu1 %v1885_v31  ;;  %v1626_v38 = vld [vmem:[%s2422_s8 + $0x2] ss:$0 sm:$0xff] }
  0x1a   : > { %513 = vmatpush1.bf16.msra.mxu0 %v1874_v2  ;;  %551 = vst.msk [vmem:[#allocation2] sm:$0x1] %vm550_vm1, %v386_v15  ;;  %v557_v18 = vld [vmem:[%s2424_s10] sm:$0xf]  ;;  %1714 = vmatprep.subr.bf16.mxu1 %v1988_v32  ;;  %v1992_v53 = vmov 65535   ;;  %vm703_vm9 = vcmask 36864  }
  0x1b   : > { %514 = vmatprep.subr.bf16.mxu0 %v1987_v1  ;;  %1624 = vmatprep.mubr.msk.bf16.mxu0 %vm506_vm0, %v432_v7  ;;  %v1886_v33 = vld [vmem:[%s2416_s2] sm:$0xff]   ;;  %v724_v54 = vsel %vm722_vm7, 4294967295, %v1992_v53  ;;  %s1994_s14 = smov 120   ;;  %vm718_vm10 = vcmask 39936   ;;  %vm770_vm11 = vcmask 59392   ;;  %s1998_s22 = smov 48  }
  0x1c   : > { %v1627_v40 = vld [vmem:[%s2422_s8 + $0x3] ss:$0 sm:$0xff]  ;;  %v1628_v44 = vld [vmem:[%s2423_s9] ss:$0 sm:$0xff]  ;;  %v2204_v55 = vsel %vm723_vm8, %v724_v54, 0  ;;  %s2001_s29 = smov 40  }
  0x1d   : > { %1715 = vmatpush3.bf16.msra.mxu1 %v1886_v33  ;;  %vm771_vm12 = vsmask.f32 2304  ;;  %vm893_vm14 = vcmask 124992   ;;  %vm1137_vm7 = vcmask 256192  }
  0x1e   : > { %515 = vmatpush1.bf16.msra.mxu0 %v1875_v3  ;;  %1720 = vmatprep.subr.bf16.mxu1 %v1988_v32  ;;  %vm772_vm13 = vmand %vm770_vm11, %vm771_vm12 }
  0x1f   : > { %516 = vmatprep.subr.bf16.mxu0 %v1987_v1  ;;  %vm894_vm15 = vmand %vm893_vm14, %vm771_vm12 }
  0x20   : > { %vm1138_vm8 = vmand %vm1137_vm7, %vm771_vm12 }
  0x22   : > { %517 = vmatpush1.bf16.msra.mxu0 %v1876_v4 }
  0x23   : > { %518 = vmatprep.subr.bf16.mxu0 %v1987_v1 }
  0x26   : > { %519 = vmatpush1.bf16.msra.mxu0 %v1877_v5 }
  0x27   : > { %520 = vmatprep.subr.bf16.mxu0 %v1987_v1 }
  0x2a   : > { %521 = vmatpush1.bf16.msra.mxu0 %v1878_v8 }
  0x2b   : > { %522 = vmatprep.subr.bf16.mxu0 %v1987_v1 }
  0x2e   : > { %523 = vmatpush1.bf16.msra.mxu0 %v1879_v9 }
  0x2f   : > { %524 = vmatprep.subr.bf16.mxu0 %v1987_v1 }
  0x32   : > { %525 = vmatpush1.bf16.msra.mxu0 %v1880_v10 }
  0x33   : > { %534 = vmatprep.subr.bf16.mxu0 %v1987_v1 }
  0x36   : > { %535 = vmatpush2.bf16.msra.mxu0 %v1881_v11 }
  0x37   : > { %536 = vmatprep.subr.bf16.mxu0 %v1987_v1 }
  0x3a   : > { %537 = vmatpush2.bf16.msra.mxu0 %v1882_v12  ;;  %v773_v12 = vld [vmem:[#allocation3] sm:$0x7] }
  0x3b   : > { %538 = vmatprep.subr.bf16.mxu0 %v1987_v1 }
  0x3e   : > { %539 = vmatpush2.bf16.msra.mxu0 %v1883_v13 }
  0x3f   : > { %540 = vmatprep.subr.bf16.mxu0 %v1987_v1 }
  0x42   : > { %541 = vmatpush2.bf16.msra.mxu0 %v1884_v14 }
  0x43   : > { %1762 = vmatprep.subr.bf16.mxu0 %v1988_v32 }
  0x45   : > { %543 = vmatmul.mubr.bf16.vlgmr.msra.gmra.mxu0 %v1611_v6 }
  0x46   : > { %1764 = vmatprep.mubr.msk.bf16.mxu0 %vm1989_vm4, %v1988_v32 }
 0x105   : > { %v544_v17 = vpop.f32.mrf.mxu0 }
 0x106   : > { %v556_v19 = vadd.f32 %v1625_v16, %v544_v17 }
 0x107   : > { %v546_v20 = vpop.f32.mrf.mxu0 }
 0x108   : > { %v558_v21 = vadd.f32 %v557_v18, %v556_v19 }
 0x109   : > { %v547_v22 = vpop.f32.mrf.mxu0 }
 0x10a   : > { %560 = vst.msk [vmem:[#allocation2 + $0x1] sm:$0xf] %vm559_vm2, %v558_v21  ;;  %vm1015_vm2 = vcmask 190592  }
 0x10b   : > { %v548_v23 = vpop.f32.mrf.mxu0 }
 0x111   : > { %v2166_v24 = vld [vmem:[#allocation2] sm:$0x1f] }
 0x112   : > { %v563_v25 = vsel %vm562_vm3, %v2166_v24, 0.0 }
 0x113   : > { %564 = vadd.xlane.f32.xlu0 %v563_v25 }
 0x19c   : > { %v565_v26 = vpop.xlane.xlu0 %564 }
 0x19d   : > { %v567_v27 = vmul.f32 0.03125, %v565_v26 }
 0x19f   : > { %v568_v28 = vsub.f32 %v2166_v24, %v567_v27 }
 0x1a1   : > { %v569_v29 = vmul.f32 %v568_v28, %v568_v28 }
 0x1a3   : > { %v570_v30 = vsel %vm562_vm3, %v569_v29, 0.0 }
 0x1a4   : > { %571 = vadd.xlane.f32.xlu0 %v570_v30 }
 0x22d   : > { %v572_v34 = vpop.xlane.xlu0 %571 }
 0x22e   : > { %v573_v35 = vmul.f32 0.03125, %v572_v34 }
 0x230   : > { %v574_v36 = vadd.f32 1e-05, %v573_v35 }
 0x232   : > { %1901 = vrsqrt.f32 %v574_v36 }
 0x23f   : > { %v1902_v37 = vpop.eup %1901 }
 0x240   : > { %v576_v39 = vmul.f32 %v1902_v37, %v568_v28 }
 0x242   : > { %v581_v41 = vmul.f32 %v1626_v38, %v576_v39 }
 0x244   : > { %v586_v42 = vadd.f32 %v1627_v40, %v581_v41 }
 0x246   : > { %v587_v43 = vpack.c.bf16 %v586_v42, %v586_v42 }
 0x248   : > { %1717 = vmatmul.mubr.msk.bf16.vlgmr.msra.gmra.mxu1 %vm608_vm5, %v587_v43 }
 0x249   : > { %1722 = vmatprep.mubr.msk.bf16.mxu1 %vm1989_vm4, %v1988_v32 }
 0x308   : > { %v646_v45 = vpop.f32.mrf.mxu1 }
 0x309   : > { %v647_v46 = vadd.f32 %v1628_v44, %v646_v45 }
 0x30a   : > { %v1718_v47 = vpop.f32.mrf.mxu1 }
 0x30b   : > { %v2198_v48 = vpack.c.bf16 %v647_v46, %v647_v46 }
 0x30c   : > { %v649_v49 = vpop.f32.mrf.mxu1 }
 0x30d   : > { %716 = vrot.lane.b32.xlu0 %v2198_v48, %s1990_s30  ;;  %654 = vrot.lane.b32.xlu1 %v2198_v48, %s1991_s12  ;;  %s2002_s30 = smov 8   ;;  %s2003_s12 = smov 16  }
 0x30e   : > { %v1719_v50 = vpop.f32.mrf.mxu1 }
 0x37f   : > { %v655_v51 = vpop.permute.xlu1 %654  ;;  %v717_v56 = vpop.permute.xlu0 %716 }
 0x380   : > { %v661_v52 = vsel %vm656_vm6, %v655_v51, 0  ;;  %v727_v57 = vand.u32 %v2204_v55, %v717_v56 }
 0x381   : > { %1721 = vmatpush3.bf16.xpose.msra.mxu1 %v661_v52 }
 0x382   : > { %1726 = vmatprep.subr.bf16.mxu1 %v1988_v32 }
 0x388   : > { %1723 = vmatmul.mubr.msk.bf16.vlgmr.msra.gmra.mxu1 %vm656_vm6, %v2198_v48 }
 0x389   : > { %1727 = vmatpush3.bf16.msra.mxu1 %v727_v57  ;;  %1728 = vmatprep.mubr.msk.bf16.mxu1 %vm1989_vm4, %v1988_v32 }
 0x38a   : > { %1732 = vmatprep.subr.bf16.mxu1 %v1988_v32 }
 0x448   : > { %v697_v58 = vpop.f32.mrf.mxu1 }
 0x449   : > { %v704_v59 = vsel %vm703_vm9, %v697_v58, -inf }
 0x44a   : > { %705 = vmax.xlane.f32.xlu1 %v704_v59  ;;  %v1724_v60 = vpop.f32.mrf.mxu1 }
 0x44c   : > { %v700_v61 = vpop.f32.mrf.mxu1 }
 0x44e   : > { %v1725_v62 = vpop.f32.mrf.mxu1 }
 0x4d3   : > { %v706_v63 = vpop.xlane.xlu1 %705 }
 0x4d4   : > { %v707_v0 = vsub.f32 %v697_v58, %v706_v63 }
 0x4d6   : > { %v708_v1 = vmul.f32 1.442695, %v707_v0 }
 0x4d8   : > { %1903 = vpow2.f32 %v708_v1 }
 0x4e5   : > { %v1904_v2 = vpop.eup %1903 }
 0x4e6   : > { %v710_v3 = vsel %vm703_vm9, %v1904_v2, 0.0 }
 0x4e7   : > { %711 = vadd.xlane.f32.xlu0 %v710_v3 }
 0x4fd   : > { %778 = vrot.lane.b32.xlu0 %v2198_v48, %s1993_s13 }
 0x501   : > { %776 = vrot.lane.b32.xlu0 %v2198_v48, %s1994_s14  ;;  %s377_s14 = sand.u32 1, %s1977_s18  }
 0x570   : > { %v712_v4 = vpop.xlane.xlu0 %711 }
 0x571   : > { %1905 = vrcp.f32 %v712_v4 }
 0x574   : > { %v779_v7 = vpop.permute.xlu0 %778 }
 0x575   : > { %v784_v9 = vsel %vm656_vm6, %v779_v7, 0 }
 0x578   : > { %v777_v10 = vpop.permute.xlu0 %776 }
 0x57e   : > { %v1906_v5 = vpop.eup %1905 }
 0x57f   : > { %v714_v6 = vmul.f32 %v1906_v5, %v1904_v2 }
 0x581   : > { %v715_v8 = vpack.c.bf16 %v714_v6, %v714_v6 }
 0x583   : > { %1729 = vmatmul.mubr.msk.bf16.vlgmr.msra.gmra.mxu1 %vm718_vm10, %v715_v8 }
 0x584   : > { %1733 = vmatpush3.bf16.xpose.msra.mxu1 %v784_v9  ;;  %1734 = vmatprep.mubr.msk.bf16.mxu1 %vm1989_vm4, %v1988_v32 }
 0x585   : > { %1738 = vmatprep.subr.bf16.mxu1 %v1988_v32 }
 0x58b   : > { %1735 = vmatmul.mubr.msk.bf16.vlgmr.msra.gmra.mxu1 %vm656_vm6, %v777_v10 }
 0x58c   : > { %1740 = vmatprep.mubr.msk.bf16.mxu1 %vm1989_vm4, %v1988_v32 }
 0x643   : > { %v763_v11 = vpop.f32.mrf.mxu1 }
 0x644   : > { %v769_v13 = vpack.c.bf16 %v763_v11, %v763_v11 }
 0x645   : > { %v1730_v14 = vpop.f32.mrf.mxu1 }
 0x646   : > { %v774_v15 = vsel %vm772_vm13, %v769_v13, %v773_v12 }
 0x647   : > { %775 = vst [vmem:[#allocation3] sm:$0x7] %v774_v15  ;;  %v766_v16 = vpop.f32.mrf.mxu1 }
 0x649   : > { %v1731_v17 = vpop.f32.mrf.mxu1 }
 0x64b   : > { %v820_v18 = vpop.f32.mrf.mxu1 }
 0x64c   : > { %v826_v19 = vsel %vm703_vm9, %v820_v18, -inf }
 0x64d   : > { %827 = vmax.xlane.f32.xlu1 %v826_v19  ;;  %v1736_v20 = vpop.f32.mrf.mxu1 }
 0x64e   : > { %v895_v16 = vld [vmem:[#allocation3] sm:$0x7] }
 0x64f   : > { %v823_v21 = vpop.f32.mrf.mxu1 }
 0x651   : > { %v1737_v22 = vpop.f32.mrf.mxu1 }
 0x65e   : > { %838 = vrot.lane.b32.xlu1 %v2198_v48, %s1995_s15 }
 0x662   : > { %900 = vrot.lane.b32.xlu1 %v2198_v48, %s1996_s26 }
 0x666   : > { %898 = vrot.lane.b32.xlu1 %v2198_v48, %s1997_s16  ;;  %s2004_s16 = smov 24  }
 0x6d6   : > { %v828_v23 = vpop.xlane.xlu1 %827 }
 0x6d7   : > { %v829_v25 = vsub.f32 %v820_v18, %v828_v23 }
 0x6d9   : > { %v830_v26 = vmul.f32 1.442695, %v829_v25 }
 0x6da   : > { %v839_v27 = vpop.permute.xlu1 %838 }
 0x6db   : > { %1907 = vpow2.f32 %v830_v26  ;;  %v844_v28 = vand.u32 %v839_v27, %v2204_v55  ;;  %v1887_v27 = vld [vmem:[%s2417_s3 + $0x8] sm:$0xff]  }
 0x6dd   : > { %1739 = vmatpush3.bf16.msra.mxu1 %v844_v28  ;;  %v1888_v28 = vld [vmem:[%s2417_s3] sm:$0xff]  }
 0x6de   : > { %1744 = vmatprep.subr.bf16.mxu1 %v1988_v32  ;;  %v901_v35 = vpop.permute.xlu1 %900 }
 0x6df   : > { %v906_v37 = vsel %vm656_vm6, %v901_v35, 0 }
 0x6e2   : > { %v899_v39 = vpop.permute.xlu1 %898 }
 0x6e8   : > { %v1908_v29 = vpop.eup %1907 }
 0x6e9   : > { %v832_v30 = vsel %vm703_vm9, %v1908_v29, 0.0 }
 0x6ea   : > { %833 = vadd.xlane.f32.xlu0 %v832_v30 }
 0x700   : > { %960 = vrot.lane.b32.xlu0 %v2198_v48, %s1998_s22  ;;  %s378_s22 = scalar_lea.vmem [#allocation4], %s377_s14 }
 0x773   : > { %v834_v31 = vpop.xlane.xlu0 %833 }
 0x774   : > { %1909 = vrcp.f32 %v834_v31 }
 0x777   : > { %v961_v38 = vpop.permute.xlu0 %960 }
 0x778   : > { %v966_v40 = vand.u32 %v961_v38, %v2204_v55 }
 0x781   : > { %v1910_v33 = vpop.eup %1909 }
 0x782   : > { %v836_v34 = vmul.f32 %v1910_v33, %v1908_v29 }
 0x784   : > { %v837_v36 = vpack.c.bf16 %v836_v34, %v836_v34 }
 0x786   : > { %1741 = vmatmul.mubr.msk.bf16.vlgmr.msra.gmra.mxu1 %vm718_vm10, %v837_v36 }
 0x787   : > { %1745 = vmatpush3.bf16.xpose.msra.mxu1 %v906_v37  ;;  %1746 = vmatprep.mubr.msk.bf16.mxu1 %vm1989_vm4, %v1988_v32 }
 0x788   : > { %1750 = vmatprep.subr.bf16.mxu1 %v1988_v32 }
 0x78e   : > { %1747 = vmatmul.mubr.msk.bf16.vlgmr.msra.gmra.mxu1 %vm656_vm6, %v899_v39  ;;  %v1643_v39 = vld [vmem:[%s2422_s8 + $0x4] ss:$0 sm:$0xff] }
 0x78f   : > { %1751 = vmatpush3.bf16.msra.mxu1 %v966_v40  ;;  %1752 = vmatprep.mubr.msk.bf16.mxu1 %vm1989_vm4, %v1988_v32 }
 0x790   : > { %1756 = vmatprep.subr.bf16.mxu1 %v1988_v32 }
 0x846   : > { %v880_v41 = vpop.f32.mrf.mxu1 }
 0x847   : > { %v1671_v9 = vpack.c.bf16 %v880_v41, %v880_v41 }
 0x848   : > { %v1742_v42 = vpop.f32.mrf.mxu1 }
 0x84a   : > { %v883_v43 = vpop.f32.mrf.mxu1 }
 0x84c   : > { %v1743_v44 = vpop.f32.mrf.mxu1 }
 0x84e   : > { %v942_v45 = vpop.f32.mrf.mxu1 }
 0x84f   : > { %v948_v46 = vsel %vm703_vm9, %v942_v45, -inf }
 0x850   : > { %949 = vmax.xlane.f32.xlu1 %v948_v46  ;;  %v1748_v47 = vpop.f32.mrf.mxu1 }
 0x852   : > { %v945_v49 = vpop.f32.mrf.mxu1 }
 0x854   : > { %v1749_v50 = vpop.f32.mrf.mxu1 }
 0x8d9   : > { %v950_v51 = vpop.xlane.xlu1 %949 }
 0x8da   : > { %v951_v52 = vsub.f32 %v942_v45, %v950_v51 }
 0x8dc   : > { %v952_v53 = vmul.f32 1.442695, %v951_v52 }
 0x8de   : > { %1911 = vpow2.f32 %v952_v53  ;;  %v1889_v53 = vld [vmem:[%s2418_s4 + $0x8] sm:$0xff]  }
 0x8eb   : > { %v1912_v54 = vpop.eup %1911 }
 0x8ec   : > { %v954_v56 = vsel %vm703_vm9, %v1912_v54, 0.0 }
 0x8ed   : > { %955 = vadd.xlane.f32.xlu0 %v954_v56 }
 0x903   : > { %1022 = vrot.lane.b32.xlu0 %v2198_v48, %s1999_s24  ;;  %s1550_s24 = sshll.u32 %s378_s22, 4  ;;  %s2375_s24 = int_to_ptr.vmem [resolvable:$true] %s1550_s24 }
 0x904   : > { %s1925_s13 = scalar_lea.vmem %s2375_s24, 16 }
 0x905   : > { %p1926_p11 = scmp.ne.s32.totalorder %s2375_s24, %s1925_s13 }
 0x907   : > { %1020 = vrot.lane.b32.xlu0 %v2198_v48, %s2000_s25  ;;  %p1927_p12 = pnand %p1926_p11, %p2104_p5 }
 0x909   : > { %p1928_p13 = pneg %p1927_p12 }
 0x976   : > { %v956_v57 = vpop.xlane.xlu0 %955 }
 0x977   : > { %1913 = vrcp.f32 %v956_v57 }
 0x97a   : > { %v1023_v60 = vpop.permute.xlu0 %1022 }
 0x97b   : > { %v1028_v62 = vsel %vm656_vm6, %v1023_v60, 0 }
 0x97e   : > { %v1021_v63 = vpop.permute.xlu0 %1020 }
 0x984   : > { %v1914_v58 = vpop.eup %1913 }
 0x985   : > { %v958_v59 = vmul.f32 %v1914_v58, %v1912_v54 }
 0x987   : > { %v959_v61 = vpack.c.bf16 %v958_v59, %v958_v59  ;;  %v1647_v59 = vld [vmem:[%s2422_s8 + $0x5] ss:$0 sm:$0xff] }
 0x989   : > { %1753 = vmatmul.mubr.msk.bf16.vlgmr.msra.gmra.mxu1 %vm718_vm10, %v959_v61  ;;  %v1648_v61 = vld [vmem:[%s2422_s8 + $0x6] ss:$0 sm:$0xff] }
 0x98a   : > { %1757 = vmatpush3.bf16.xpose.msra.mxu1 %v1028_v62  ;;  %1758 = vmatprep.mubr.msk.bf16.mxu1 %vm1989_vm4, %v1988_v32 }
 0x98b   : > { %1768 = vmatprep.subr.bf16.mxu1 %v1988_v32 }
 0x991   : > { %1759 = vmatmul.mubr.msk.bf16.vlgmr.msra.gmra.mxu1 %vm656_vm6, %v1021_v63  ;;  %vm1016_vm6 = vmand %vm1015_vm2, %vm771_vm12 }
 0x992   : > { %1772 = vmatprep.mubr.msk.bf16.mxu1 %vm1989_vm4, %v1988_v32  ;;  %1769 = vmatpush3.bf16.msra.mxu1 %v1887_v27 }
 0x993   : > { %1770 = vmatprep.subr.bf16.mxu1 %v1988_v32 }
 0x996   : > { %1771 = vmatpush3.bf16.msra.mxu1 %v1888_v28 }
 0x997   : > { %1784 = vmatprep.subr.bf16.mxu1 %v1988_v32 }
 0xa49   : > { %v1002_v0 = vpop.f32.mrf.mxu1 }
 0xa4a   : > { %v1672_v10 = vpack.c.bf16 %v1002_v0, %v1002_v0 }
 0xa4b   : > { %v1754_v1 = vpop.f32.mrf.mxu1 }
 0xa4c   : > { %v1891_v1 = vld [vmem:[%s2419_s5 + $0x18] sm:$0xff]  }
 0xa4d   : > { %v1005_v2 = vpop.f32.mrf.mxu1 }
 0xa4e   : > { %v1892_v2 = vld [vmem:[%s2419_s5 + $0x10] sm:$0xff]  }
 0xa4f   : > { %v1755_v3 = vpop.f32.mrf.mxu1 }
 0xa50   : > { %v1893_v3 = vld [vmem:[%s2419_s5 + $0x8] sm:$0xff]  }
 0xa51   : > { %v1064_v4 = vpop.f32.mrf.mxu1 }
 0xa52   : > { %v1070_v5 = vsel %vm703_vm9, %v1064_v4, -inf }
 0xa53   : > { %1071 = vmax.xlane.f32.xlu1 %v1070_v5  ;;  %v1760_v6 = vpop.f32.mrf.mxu1  ;;  %v1649_v5 = vld [vmem:[%s2423_s9 + $0x1] ss:$0 sm:$0xff] }
 0xa55   : > { %v1067_v7 = vpop.f32.mrf.mxu1 }
 0xa57   : > { %v1761_v8 = vpop.f32.mrf.mxu1 }
 0xa64   : > { %1082 = vrot.lane.b32.xlu1 %v2198_v48, %s2001_s29 }
 0xa68   : > { %890 = vrot.lane.b32.xlu1 %v1671_v9, %s2002_s30 }
 0xa6c   : > { %1012 = vrot.lane.b32.xlu1 %v1672_v10, %s2003_s12  ;;  %s1538_s12 = scalar_lea.sflag [#allocation5], %s377_s14 }
 0xadc   : > { %v1072_v11 = vpop.xlane.xlu1 %1071 }
 0xadd   : > { %v1073_v12 = vsub.f32 %v1064_v4, %v1072_v11  ;;  %v1894_v4 = vld [vmem:[%s2419_s5] sm:$0xff]  }
 0xadf   : > { %v1074_v13 = vmul.f32 1.442695, %v1073_v12 }
 0xae0   : > { %v1083_v14 = vpop.permute.xlu1 %1082 }
 0xae1   : > { %1915 = vpow2.f32 %v1074_v13  ;;  %v1088_v15 = vand.u32 %v1083_v14, %v2204_v55 }
 0xae3   : > { %1763 = vmatpush3.bf16.msra.mxu0 %v1088_v15 }
 0xae4   : > { %v891_v17 = vpop.permute.xlu1 %890  ;;  %1776 = vmatprep.subr.bf16.mxu0 %v1988_v32 }
 0xae5   : > { %v896_v48 = vsel %vm894_vm15, %v891_v17, %v895_v16 }
 0xae6   : > { %897 = vst [vmem:[#allocation3] sm:$0x7] %v896_v48 }
 0xae8   : > { %v1013_v19 = vpop.permute.xlu1 %1012 }
 0xaed   : > { %v1017_v18 = vld [vmem:[#allocation3] sm:$0x7] }
 0xaee   : > { %v1916_v20 = vpop.eup %1915  ;;  %v1018_v21 = vsel %vm1016_vm6, %v1013_v19, %v1017_v18 }
 0xaef   : > { %1019 = vst [vmem:[#allocation3] sm:$0x7] %v1018_v21  ;;  %v1076_v22 = vsel %vm703_vm9, %v1916_v20, 0.0 }
 0xaf0   : > { %1077 = vadd.xlane.f32.xlu0 %v1076_v22 }
 0xaf6   : > { %v1139_v35 = vld [vmem:[#allocation3] sm:$0x7] }
 0xb79   : > { %v1078_v55 = vpop.xlane.xlu0 %1077 }
 0xb7a   : > { %1917 = vrcp.f32 %v1078_v55 }
 0xb87   : > { %v1918_v23 = vpop.eup %1917 }
 0xb88   : > { %v1080_v25 = vmul.f32 %v1918_v23, %v1916_v20  ;;  %v1653_v20 = vld [vmem:[%s2422_s8 + $0x7] ss:$0 sm:$0xff] }
 0xb8a   : > { %v1081_v26 = vpack.c.bf16 %v1080_v25, %v1080_v25 }
 0xb8c   : > { %1765 = vmatmul.mubr.msk.bf16.vlgmr.msra.gmra.mxu0 %vm718_vm10, %v1081_v26 }
 0xb8d   : > { %1780 = vmatprep.mubr.msk.bf16.mxu0 %vm1989_vm4, %v1988_v32  ;;  %1777 = vmatpush3.bf16.msra.mxu0 %v1889_v53 }
 0xb8e   : > { %1778 = vmatprep.subr.bf16.mxu0 %v1988_v32 }
 0xc4c   : > { %v1124_v29 = vpop.f32.mrf.mxu0 }
 0xc4d   : > { %v1673_v30 = vpack.c.bf16 %v1124_v29, %v1124_v29 }
 0xc4e   : > { %v1766_v31 = vpop.f32.mrf.mxu0 }
 0xc4f   : > { %1134 = vrot.lane.b32.xlu1 %v1673_v30, %s2004_s16  ;;  %s1667_s16 = sshll.u32 %s2087_s21, 4  ;;  %s2005_s21 = smov [#allocation4]  }
 0xc50   : > { %v1127_v33 = vpop.f32.mrf.mxu0  ;;  %s2373_s30 = scalar_lea.hbm %s2425_s11, %s1667_s16  ;;  %s1929_s15 = sshll.u32 %s2005_s21, 4  ;;  %s1930_s15 = int_to_ptr.vmem [resolvable:$false] %s1929_s15 }
 0xc51   : > { %s1931_s26 = scalar_lea.vmem %s1930_s15, 32  ;;  %p1932_p0 = scmp.lt.s32.totalorder %s2375_s24, %s1930_s15 }
 0xc52   : > { %v1767_v34 = vpop.f32.mrf.mxu0  ;;  %p1933_p1 = scmp.lt.s32.totalorder %s1931_s26, %s1925_s13 }
 0xc53   : > { %v1895_v34 = vld [vmem:[%s2420_s6 + $0x8] sm:$0xff]  }
 0xc54   : > { %p1934_p2 = por %p1933_p1, %p1932_p0 }
 0xc56   : > { %p1935_p3 = pnand %p1934_p2, %p1928_p13 }
 0xcc1   : > { %v1135_v36 = vpop.permute.xlu1 %1134 }
 0xcc2   : > { %v1140_v37 = vsel %vm1138_vm8, %v1135_v36, %v1139_v35  ;;  %v1896_v35 = vld [vmem:[%s2420_s6] sm:$0xff]  }
 0xcc3   : > { %1141 = vst [vmem:[#allocation3] sm:$0x7] %v1140_v37 }
 0xcca   : > { %v1142_v38 = vld [vmem:[#allocation3] sm:$0x7] }
 0xccb   : > { %1773 = vmatmul.mubr.msk.bf16.vlgmr.msra.gmra.mxu1 %vm608_vm5, %v1142_v38 }
 0xccc   : > { %1792 = vmatprep.mubr.msk.bf16.mxu1 %vm1989_vm4, %v1988_v32  ;;  %1785 = vmatpush3.bf16.msra.mxu1 %v1891_v1 }
 0xccd   : > { %1786 = vmatprep.subr.bf16.mxu1 %v1988_v32 }
 0xcd0   : > { %1787 = vmatpush3.bf16.msra.mxu1 %v1892_v2 }
 0xcd1   : > { %1788 = vmatprep.subr.bf16.mxu1 %v1988_v32 }
 0xcd4   : > { %1789 = vmatpush3.bf16.msra.mxu1 %v1893_v3 }
 0xcd5   : > { %1790 = vmatprep.subr.bf16.mxu1 %v1988_v32 }
 0xcd8   : > { %1791 = vmatpush3.bf16.msra.mxu1 %v1894_v4 }
 0xd8b   : > { %v1200_v40 = vpop.f32.mrf.mxu1 }
 0xd8c   : > { %v1201_v41 = vadd.f32 %v1643_v39, %v1200_v40  ;;  %v393_v40 = vld [vmem:[%s2422_s8 + $0x8] sm:$0x1] }
 0xd8d   : > { %v1774_v42 = vpop.f32.mrf.mxu1 }
 0xd8e   : > { %v2281_v43 = vadd.f32 %v1201_v41, %v2166_v24  ;;  %v1890_v24 = vld [vmem:[%s2418_s4] sm:$0xff]   ;;  %v394_v42 = vld [vmem:[%s2422_s8 + $0x9] sm:$0x1] }
 0xd8f   : > { %v1203_v44 = vpop.f32.mrf.mxu1  ;;  %1779 = vmatpush3.bf16.msra.mxu0 %v1890_v24 }
 0xd90   : > { %v1207_v45 = vsel %vm562_vm3, %v2281_v43, 0.0  ;;  %1796 = vmatprep.subr.bf16.mxu0 %v1988_v32 }
 0xd91   : > { %1208 = vadd.xlane.f32.xlu0 %v1207_v45  ;;  %v1775_v46 = vpop.f32.mrf.mxu1  ;;  %v1897_v45 = vld [vmem:[%s2421_s7 + $0x18] sm:$0xff]  }
 0xe1a   : > { %v1209_v47 = vpop.xlane.xlu0 %1208 }
 0xe1b   : > { %v1210_v49 = vmul.f32 0.03125, %v1209_v47  ;;  %v1898_v47 = vld [vmem:[%s2421_s7 + $0x10] sm:$0xff]  }
 0xe1d   : > { %v1211_v50 = vsub.f32 %v2281_v43, %v1210_v49  ;;  %v1899_v49 = vld [vmem:[%s2421_s7 + $0x8] sm:$0xff]  }
 0xe1f   : > { %v1212_v51 = vmul.f32 %v1211_v50, %v1211_v50 }
 0xe21   : > { %v1213_v52 = vsel %vm562_vm3, %v1212_v51, 0.0  ;;  %v397_v51 = vld [vmem:[%s2423_s9 + $0x2] sm:$0x1] }
 0xe22   : > { %1214 = vadd.xlane.f32.xlu1 %v1213_v52 }
 0xeab   : > { %v1215_v54 = vpop.xlane.xlu1 %1214 }
 0xeac   : > { %v1216_v56 = vmul.f32 0.03125, %v1215_v54 }
 0xeae   : > { %v1217_v57 = vadd.f32 1e-05, %v1216_v56 }
 0xeb0   : > { %1919 = vrsqrt.f32 %v1217_v57 }
 0xebd   : > { %v1920_v58 = vpop.eup %1919 }
 0xebe   : > { %v1219_v60 = vmul.f32 %v1920_v58, %v1211_v50  ;;  %v1900_v50 = vld [vmem:[%s2421_s7] sm:$0xff]  }
 0xec0   : > { %v1224_v62 = vmul.f32 %v1647_v59, %v1219_v60 }
 0xec2   : > { %v1229_v63 = vadd.f32 %v1648_v61, %v1224_v62 }
 0xec4   : > { %v1230_v0 = vpack.c.bf16 %v1229_v63, %v1229_v63 }
 0xec6   : > { %1781 = vmatmul.mubr.msk.bf16.vlgmr.msra.gmra.mxu0 %vm608_vm5, %v1230_v0 }
 0xec7   : > { %1800 = vmatprep.mubr.msk.bf16.mxu0 %vm1989_vm4, %v1988_v32  ;;  %1797 = vmatpush3.bf16.msra.mxu0 %v1895_v34 }
 0xec8   : > { %1798 = vmatprep.subr.bf16.mxu0 %v1988_v32 }
 0xecb   : > { %1799 = vmatpush3.bf16.msra.mxu0 %v1896_v35 }
 0xecc   : > { %1804 = vmatprep.subr.bf16.mxu0 %v1988_v32 }
 0xf86   : > { %v1288_v6 = vpop.f32.mrf.mxu0 }
 0xf87   : > { %v1289_v7 = vadd.f32 %v1649_v5, %v1288_v6 }
 0xf88   : > { %v1782_v8 = vpop.f32.mrf.mxu0 }
 0xf89   : > { %v1294_v9 = vmul.f32 %v1289_v7, %v1289_v7 }
 0xf8a   : > { %v1291_v10 = vpop.f32.mrf.mxu0 }
 0xf8b   : > { %v1295_v11 = vmul.f32 %v1294_v9, %v1289_v7 }
 0xf8c   : > { %v1783_v12 = vpop.f32.mrf.mxu0 }
 0xf8d   : > { %v1296_v13 = vmul.f32 0.044715, %v1295_v11 }
 0xf8f   : > { %v1297_v14 = vadd.f32 %v1296_v13, %v1289_v7 }
 0xf91   : > { %v1298_v15 = vmul.f32 0.7978846, %v1297_v14 }
 0xf93   : > { %1921 = vtanh.f32 %v1298_v15 }
 0xfa0   : > { %v1922_v16 = vpop.eup %1921 }
 0xfa1   : > { %v1300_v17 = vadd.f32 1.0, %v1922_v16 }
 0xfa3   : > { %v1301_v48 = vmul.f32 0.5, %v1300_v17 }
 0xfa5   : > { %v1302_v18 = vmul.f32 %v1301_v48, %v1289_v7 }
 0xfa7   : > { %v1303_v19 = vpack.c.bf16 %v1302_v18, %v1302_v18 }
 0xfa9   : > { %1793 = vmatmul.mubr.msk.bf16.vlgmr.msra.gmra.mxu1 %vm506_vm0, %v1303_v19 }
0x1069   : > { %v1377_v21 = vpop.f32.mrf.mxu1 }
0x106a   : > { %v1378_v22 = vadd.f32 %v1653_v20, %v1377_v21 }
0x106b   : > { %v1794_v55 = vpop.f32.mrf.mxu1 }
0x106c   : > { %v1383_v23 = vadd.f32 %v1378_v22, %v2281_v43 }
0x106d   : > { %v1380_v25 = vpop.f32.mrf.mxu1 }
0x106e   : > { %v1384_v26 = vsel %vm550_vm1, %v1383_v23, 0.0 }
0x106f   : > { %1385 = vadd.xlane.f32.xlu0 %v1384_v26  ;;  %v1795_v27 = vpop.f32.mrf.mxu1 }
0x10f8   : > { %v1386_v28 = vpop.xlane.xlu0 %1385 }
0x10f9   : > { %v1387_v29 = vmul.f32 0.03125, %v1386_v28 }
0x10fb   : > { %v1388_v30 = vsub.f32 %v1383_v23, %v1387_v29 }
0x10fd   : > { %v1389_v31 = vmul.f32 %v1388_v30, %v1388_v30 }
0x10ff   : > { %v1390_v33 = vsel %vm550_vm1, %v1389_v31, 0.0 }
0x1100   : > { %1391 = vadd.xlane.f32.xlu0 %v1390_v33 }
0x1189   : > { %v1392_v36 = vpop.xlane.xlu0 %1391 }
0x118a   : > { %v1393_v37 = vmul.f32 0.03125, %v1392_v36 }
0x118c   : > { %v1394_v38 = vadd.f32 1e-05, %v1393_v37 }
0x118e   : > { %1923 = vrsqrt.f32 %v1394_v38 }
0x119b   : > { %v1924_v39 = vpop.eup %1923 }
0x119c   : > { %v1396_v41 = vmul.f32 %v1924_v39, %v1388_v30 }
0x119e   : > { %v1397_v43 = vmul.f32 %v1396_v41, %v393_v40 }
0x11a0   : > { %v1398_v44 = vadd.f32 %v1397_v43, %v394_v42 }
0x11a2   : > { %v1399_v46 = vpack.c.bf16 %v1398_v44, %v1398_v44 }
0x11a4   : > { %1801 = vmatmul.mubr.msk.bf16.vlgmr.msra.gmra.mxu0 %vm608_vm5, %v1399_v46 }
0x11a5   : > { %1805 = vmatpush3.bf16.msra.mxu0 %v1897_v45  ;;  %1812 = vmatprep.mubr.msk.bf16.mxu0 %vm1989_vm4, %v1988_v32 }
0x11a6   : > { %1806 = vmatprep.subr.bf16.mxu0 %v1988_v32 }
0x11a9   : > { %1807 = vmatpush3.bf16.msra.mxu0 %v1898_v47 }
0x11aa   : > { %1808 = vmatprep.subr.bf16.mxu0 %v1988_v32 }
0x11ad   : > { %1809 = vmatpush3.bf16.msra.mxu0 %v1899_v49 }
0x11ae   : > { %1810 = vmatprep.subr.bf16.mxu0 %v1988_v32  ;;  %v398_v32 = vld [vmem:[%s2423_s9 + $0x3] sm:$0x1] }
0x11b1   : > { %1811 = vmatpush3.bf16.msra.mxu0 %v1900_v50 }
0x1264   : > { %v1453_v52 = vpop.f32.mrf.mxu0 }
0x1265   : > { %v1454_v53 = vadd.f32 %v1453_v52, %v397_v51 }
0x1266   : > { %v1802_v24 = vpop.f32.mrf.mxu0 }
0x1267   : > { %v1459_v54 = vmax.f32 %v1454_v53, 0.0 }
0x1268   : > { %v1456_v56 = vpop.f32.mrf.mxu0 }
0x1269   : > { %v1460_v57 = vpack.c.bf16 %v1459_v54, %v1459_v54 }
0x126a   : > { %v1803_v58 = vpop.f32.mrf.mxu0 }
0x126b   : > { %1813 = vmatmul.mubr.msk.bf16.vlgmr.msra.gmra.mxu0 %vm506_vm0, %v1460_v57 }
0x132b   : > { %v1530_v59 = vpop.f32.mrf.mxu0 }
0x132c   : > { %v1531_v60 = vadd.f32 %v1530_v59, %v398_v32 }
0x132d   : > { %v1814_v61 = vpop.f32.mrf.mxu0 }
0x132e   : > { %1536 = vst [vmem:[%s378_s22] sm:$0x1] %v1531_v60 }
0x132f   : > { %v1533_v62 = vpop.f32.mrf.mxu0 }
0x1330   : > { %1938 = shalt.err (!%p1935_p3)
}
0x1331   : > { %s1939_s16 = scalar_lea.hbm %s2373_s30, 16  ;;  %s1943_s25 = scalar_lea.hbm %s2425_s11, 32 }
0x1332   : > { %p1940_p4 = scmp.ne.s32.totalorder %s2373_s30, %s1939_s16  ;;  %p1944_p9 = scmp.lt.s32.totalorder %s2373_s30, %s2425_s11 }
0x1333   : > { %p1945_p10 = scmp.lt.s32.totalorder %s1943_s25, %s1939_s16 }
0x1334   : > { %p1941_p7 = pnand %p1940_p4, %p2104_p5 }
0x1335   : > { %p1946_p11 = por %p1945_p10, %p1944_p9 }
0x1336   : > { %p1942_p8 = pneg %p1941_p7 }
0x1338   : > { %p1947_p12 = pnand %p1946_p11, %p1942_p8 }
0x133a   : > { %1950 = shalt.err (!%p1947_p12)
}
0x133b   : > { %1816 = dma.vmem_to_hbm [thread:$0]  (%p2104_p5), %s2375_s24, 16, %s2373_s30, %s1538_s12   ;;  %v1815_v63 = vpop.f32.mrf.mxu0 }
0x133c PF: > { %p1822_p13 = scmp.ge.s32.totalorder %s1985_s20, 2  ;;  %s1562_s13 = sand.u32 1, %s1973_s17  }
0x133d   : > { %s1563_s15 = scalar_lea.sflag [#allocation5], %s1562_s13 }
0x133e   : > { %p1819_p0 = pnand %p1822_p13, %p2108_p6 }
0x1340   : > { %p1820_p1 = pneg %p1819_p0 }
0x1342   : > { %1968 = dma.done.wait (%p1820_p1), %s1563_s15, 16  }
0x1343   : > { %1970 = vsyncadd (%p1820_p1), %s1563_s15, 4294967280  ;;  %s2429_s27 = sld [smem:[#allocation7_spill]]  ;;  %p21_p2 = scmp.ge.s32.totalorder %s2091_s23, 4  }
0x1344   : > { %s2430_s17 = smov %s1977_s18  ;;  %s2431_s18 = smov %s1981_s19 }
0x1345   : > { %s2433_s20 = smov %s2091_s23  ;;  %23 = sbr.rel (!%p21_p2) target bundleno = 3 (0x3), region = 99 }
0x1349   : > { %s2432_s19 = smov %s2429_s27 }
0x134a   :  { %1567 = vsyncpa [#allocation5], 1 }
0x134b   :  { %1569 = vsyncpa [#allocation5 + $0x1], 1 }

// kernel: tpu_custom_call.1
= control target key start
LH: loop header
LB: loop body
LE: loop exit
PB: predicated region body
PF: predicated region fallthrough
CT: control target
= control target key end

     0   :  { %16 = vsyncpa [#allocation5], 0  ;;  %s2414_s0 = inlined_call_operand.vmem [shape: bf16[2,4,192], index: 0, kind: input, shape index: {}]   ;;  %s2415_s1 = inlined_call_operand.vmem [shape: bf16[192,32], index: 1, kind: input, shape index: {}]   ;;  %s2416_s2 = inlined_call_operand.vmem [shape: bf16[32,96], index: 2, kind: input, shape index: {}]   ;;  %s2417_s3 = inlined_call_operand.vmem [shape: bf16[32,32], index: 3, kind: input, shape index: {}]   ;;  %s2418_s4 = inlined_call_operand.vmem [shape: bf16[32,64], index: 4, kind: input, shape index: {}]   ;;  %s2419_s5 = inlined_call_operand.vmem [shape: bf16[64,32], index: 5, kind: input, shape index: {}]   ;;  %s2420_s6 = inlined_call_operand.vmem [shape: bf16[32,64], index: 6, kind: input, shape index: {}]   ;;  %s2421_s7 = inlined_call_operand.vmem [shape: bf16[64,128], index: 7, kind: input, shape index: {}]   ;;  %s2422_s8 = inlined_call_operand.vmem [shape: f32[10,32], index: 8, kind: input, shape index: {}]   ;;  %s2423_s9 = inlined_call_operand.vmem [shape: f32[4,128], index: 9, kind: input, shape index: {}]   ;;  %s2424_s10 = inlined_call_operand.vmem [shape: f32[4,32], index: 10, kind: input, shape index: {}]   ;;  %s2425_s11 = inlined_call_operand.hbm [shape: f32[2,1,128], index: 11, kind: output, shape index: {}]  }
   0x1   :  { %18 = vsyncpa [#allocation5 + $0x1], 0  ;;  %s2066_s17 = smov 0   ;;  %s2068_s18 = smov 0  }
   0x2   :  { %s2070_s19 = smov 0   ;;  %s2072_s20 = smov 0  }
   0x3 LB: > { %s2087_s21 = sadd.s32 4294967295, %s1985_s20   ;;  %s1605_s22 = sadd.s32 4294967294, %s1985_s20   ;;  %s1985_s20 = sphi %s2072_s20, %s2433_s20   ;;  %s1981_s19 = sphi %s2070_s19, %s2432_s19   ;;  %s1977_s18 = sphi %s2068_s18, %s2431_s18   ;;  %s1973_s17 = sphi %s2066_s17, %s2430_s17  }
   0x4   : > { %s2091_s23 = sadd.s32 1, %s1985_s20   ;;  %s267_s24 = sadd.s32 1, %s1981_s19 }
   0x5   : > { %s264_s25 = ssub.s32 %s1985_s20, %s2091_s23  ;;  %p277_p0 = scmp.ne.s32.totalorder %s1981_s19, %s1977_s18 }
   0x6   : > { %p265_p1 = scmp.eq.s32.totalorder %s264_s25, 0  ;;  %p278_p2 = scmp.eq.s32.totalorder %s2087_s21, 1 }
   0x7   : > { %p283_p3 = scmp.ne.s32.totalorder %s1977_s18, %s1973_s17  ;;  %p284_p4 = scmp.eq.s32.totalorder %s1605_s22, 1 }
   0x8   : > { %s2102_s26 = scalar_select %p265_p1, %s1981_s19, %s267_s24  }
   0x9   : > { %p2104_p5 = por %p278_p2, %p277_p0  ;;  %p2108_p6 = por %p284_p4, %p283_p3 }
   0xa   : > { %2426 = sst [smem:[#allocation7_spill]] %s2102_s26  ;;  %p1608_p7 = scmp.ge.s32.totalorder %s1985_s20, 1 }
   0xb   : > { %p340_p8 = scmp.lt.s32.totalorder %s1985_s20, 3 }
   0xd   : > { %p341_p9 = pnand %p1608_p7, %p340_p8 }
   0xe   : > { %p379_p10 = scmp.lt.s32.totalorder (!%p341_p9), %s2087_s21, 1  ;;  %s1990_s30 = smov (!%p341_p9), 64  }
   0xf   : > { %344 = sbr.rel (%p341_p9) target bundleno = 4924 (0x133c), region = 64  ;;  %s1991_s12 = smov (!%p341_p9), 96  }
  0x10   : > { %s1993_s13 = smov (!%p341_p9), 88   ;;  %s1995_s15 = smov (!%p341_p9), 56  }
  0x11   : > { %s1996_s26 = smov (!%p341_p9), 80   ;;  %s1997_s16 = smov (!%p341_p9), 112  }
  0x12   : > { %s1999_s24 = smov (!%p341_p9), 72   ;;  %s2000_s25 = smov (!%p341_p9), 104  }
  0x14   : > { %v1873_v0 = vld [vmem:[%s2415_s1 + $0x38] sm:$0xff]   ;;  %v1987_v1 = vmov 0   ;;  %v1874_v2 = vld [vmem:[%s2415_s1 + $0x30] sm:$0xff]   ;;  %s380_s14 = scalar_select %p379_p10, %s2087_s21, 1  ;;  %v1875_v3 = vld [vmem:[%s2415_s1 + $0x28] sm:$0xff]   ;;  %vm506_vm0 = vcmask 523264  }
  0x15   : > { %510 = vmatprep.subr.bf16.mxu0 %v1987_v1  ;;  %v1876_v4 = vld [vmem:[%s2415_s1 + $0x20] sm:$0xff]   ;;  %v1877_v5 = vld [vmem:[%s2415_s1 + $0x18] sm:$0xff]   ;;  %v1878_v8 = vld [vmem:[%s2415_s1 + $0x10] sm:$0xff]   ;;  %vm550_vm1 = vcmask 253952   ;;  %vm559_vm2 = vcmask 257024   ;;  %vm562_vm3 = vcmask 258048  }
  0x16   : > { %511 = vmatpush1.bf16.msra.mxu0 %v1873_v0  ;;  %s1670_s22 = sshll.u32 %s380_s14, 2  ;;  %v1879_v9 = vld [vmem:[%s2415_s1 + $0x8] sm:$0xff]   ;;  %v1880_v10 = vld [vmem:[%s2415_s1] sm:$0xff]   ;;  %v1881_v11 = vld [vmem:[%s2415_s1 + $0x58] sm:$0xff]   ;;  %v1988_v32 = vmov 0.0   ;;  %vm1989_vm4 = vmmov 0  }
  0x17   : > { %512 = vmatprep.subr.bf16.mxu0 %v1987_v1  ;;  %s383_s29 = scalar_lea.vmem %s2414_s0, %s1670_s22  ;;  %v1882_v12 = vld [vmem:[%s2415_s1 + $0x50] sm:$0xff]   ;;  %v1883_v13 = vld [vmem:[%s2415_s1 + $0x48] sm:$0xff]   ;;  %v1884_v14 = vld [vmem:[%s2415_s1 + $0x40] sm:$0xff]   ;;  %1712 = vmatprep.subr.bf16.mxu1 %v1988_v32  ;;  %vm608_vm5 = vcmask 261120   ;;  %vm656_vm6 = vcmask 64512   ;;  %vm722_vm7 = vcmask 1041408  }
  0x18   : > { %v1611_v6 = vld.sshfl [vmem:[%s383_s29] sm:$0x33 pattern:$0x76325410]  ;;  %v1885_v31 = vld [vmem:[%s2416_s2 + $0x8] sm:$0xff]   ;;  %1716 = vmatprep.mubr.msk.bf16.mxu1 %vm1989_vm4, %v1988_v32  ;;  %vm723_vm8 = vcmask 1042432  }
  0x19   : > { %v432_v7 = vcombine.high %v1611_v6, %v1611_v6  ;;  %v386_v15 = vld [vmem:[%s2422_s8 + $0x1] sm:$0x1]  ;;  %v1625_v16 = vld [vmem:[%s2422_s8] ss:$0 sm:$0xff]  ;;  %1713 = vmatpush3.bf16.msra.mxu1 %v1885_v31  ;;  %v1626_v38 = vld [vmem:[%s2422_s8 + $0x2] ss:$0 sm:$0xff] }
  0x1a   : > { %513 = vmatpush1.bf16.msra.mxu0 %v1874_v2  ;;  %551 = vst.msk [vmem:[#allocation2] sm:$0x1] %vm550_vm1, %v386_v15  ;;  %v557_v18 = vld [vmem:[%s2424_s10] sm:$0xf]  ;;  %1714 = vmatprep.subr.bf16.mxu1 %v1988_v32  ;;  %v1992_v53 = vmov 65535   ;;  %vm703_vm9 = vcmask 36864  }
  0x1b   : > { %514 = vmatprep.subr.bf16.mxu0 %v1987_v1  ;;  %1624 = vmatprep.mubr.msk.bf16.mxu0 %vm506_vm0, %v432_v7  ;;  %v1886_v33 = vld [vmem:[%s2416_s2] sm:$0xff]   ;;  %v724_v54 = vsel %vm722_vm7, 4294967295, %v1992_v53  ;;  %s1994_s14 = smov 120   ;;  %vm718_vm10 = vcmask 39936   ;;  %vm770_vm11 = vcmask 59392   ;;  %s1998_s22 = smov 48  }
  0x1c   : > { %v1627_v40 = vld [vmem:[%s2422_s8 + $0x3] ss:$0 sm:$0xff]  ;;  %v1628_v44 = vld [vmem:[%s2423_s9] ss:$0 sm:$0xff]  ;;  %v2204_v55 = vsel %vm723_vm8, %v724_v54, 0  ;;  %s2001_s29 = smov 40  }
  0x1d   : > { %1715 = vmatpush3.bf16.msra.mxu1 %v1886_v33  ;;  %vm771_vm12 = vsmask.f32 2304  ;;  %vm893_vm14 = vcmask 124992   ;;  %vm1137_vm7 = vcmask 256192  }
  0x1e   : > { %515 = vmatpush1.bf16.msra.mxu0 %v1875_v3  ;;  %1720 = vmatprep.subr.bf16.mxu1 %v1988_v32  ;;  %vm772_vm13 = vmand %vm770_vm11, %vm771_vm12 }
  0x1f   : > { %516 = vmatprep.subr.bf16.mxu0 %v1987_v1  ;;  %vm894_vm15 = vmand %vm893_vm14, %vm771_vm12 }
  0x20   : > { %vm1138_vm8 = vmand %vm1137_vm7, %vm771_vm12 }
  0x22   : > { %517 = vmatpush1.bf16.msra.mxu0 %v1876_v4 }
  0x23   : > { %518 = vmatprep.subr.bf16.mxu0 %v1987_v1 }
  0x26   : > { %519 = vmatpush1.bf16.msra.mxu0 %v1877_v5 }
  0x27   : > { %520 = vmatprep.subr.bf16.mxu0 %v1987_v1 }
  0x2a   : > { %521 = vmatpush1.bf16.msra.mxu0 %v1878_v8 }
  0x2b   : > { %522 = vmatprep.subr.bf16.mxu0 %v1987_v1 }
  0x2e   : > { %523 = vmatpush1.bf16.msra.mxu0 %v1879_v9 }
  0x2f   : > { %524 = vmatprep.subr.bf16.mxu0 %v1987_v1 }
  0x32   : > { %525 = vmatpush1.bf16.msra.mxu0 %v1880_v10 }
  0x33   : > { %534 = vmatprep.subr.bf16.mxu0 %v1987_v1 }
  0x36   : > { %535 = vmatpush2.bf16.msra.mxu0 %v1881_v11 }
  0x37   : > { %536 = vmatprep.subr.bf16.mxu0 %v1987_v1 }
  0x3a   : > { %537 = vmatpush2.bf16.msra.mxu0 %v1882_v12  ;;  %v773_v12 = vld [vmem:[#allocation3] sm:$0x7] }
  0x3b   : > { %538 = vmatprep.subr.bf16.mxu0 %v1987_v1 }
  0x3e   : > { %539 = vmatpush2.bf16.msra.mxu0 %v1883_v13 }
  0x3f   : > { %540 = vmatprep.subr.bf16.mxu0 %v1987_v1 }
  0x42   : > { %541 = vmatpush2.bf16.msra.mxu0 %v1884_v14 }
  0x43   : > { %1762 = vmatprep.subr.bf16.mxu0 %v1988_v32 }
  0x45   : > { %543 = vmatmul.mubr.bf16.vlgmr.msra.gmra.mxu0 %v1611_v6 }
  0x46   : > { %1764 = vmatprep.mubr.msk.bf16.mxu0 %vm1989_vm4, %v1988_v32 }
 0x105   : > { %v544_v17 = vpop.f32.mrf.mxu0 }
 0x106   : > { %v556_v19 = vadd.f32 %v1625_v16, %v544_v17 }
 0x107   : > { %v546_v20 = vpop.f32.mrf.mxu0 }
 0x108   : > { %v558_v21 = vadd.f32 %v557_v18, %v556_v19 }
 0x109   : > { %v547_v22 = vpop.f32.mrf.mxu0 }
 0x10a   : > { %560 = vst.msk [vmem:[#allocation2 + $0x1] sm:$0xf] %vm559_vm2, %v558_v21  ;;  %vm1015_vm2 = vcmask 190592  }
 0x10b   : > { %v548_v23 = vpop.f32.mrf.mxu0 }
 0x111   : > { %v2166_v24 = vld [vmem:[#allocation2] sm:$0x1f] }
 0x112   : > { %v563_v25 = vsel %vm562_vm3, %v2166_v24, 0.0 }
 0x113   : > { %564 = vadd.xlane.f32.xlu0 %v563_v25 }
 0x19c   : > { %v565_v26 = vpop.xlane.xlu0 %564 }
 0x19d   : > { %v567_v27 = vmul.f32 0.03125, %v565_v26 }
 0x19f   : > { %v568_v28 = vsub.f32 %v2166_v24, %v567_v27 }
 0x1a1   : > { %v569_v29 = vmul.f32 %v568_v28, %v568_v28 }
 0x1a3   : > { %v570_v30 = vsel %vm562_vm3, %v569_v29, 0.0 }
 0x1a4   : > { %571 = vadd.xlane.f32.xlu0 %v570_v30 }
 0x22d   : > { %v572_v34 = vpop.xlane.xlu0 %571 }
 0x22e   : > { %v573_v35 = vmul.f32 0.03125, %v572_v34 }
 0x230   : > { %v574_v36 = vadd.f32 1e-05, %v573_v35 }
 0x232   : > { %1901 = vrsqrt.f32 %v574_v36 }
 0x23f   : > { %v1902_v37 = vpop.eup %1901 }
 0x240   : > { %v576_v39 = vmul.f32 %v1902_v37, %v568_v28 }
 0x242   : > { %v581_v41 = vmul.f32 %v1626_v38, %v576_v39 }
 0x244   : > { %v586_v42 = vadd.f32 %v1627_v40, %v581_v41 }
 0x246   : > { %v587_v43 = vpack.c.bf16 %v586_v42, %v586_v42 }
 0x248   : > { %1717 = vmatmul.mubr.msk.bf16.vlgmr.msra.gmra.mxu1 %vm608_vm5, %v587_v43 }
 0x249   : > { %1722 = vmatprep.mubr.msk.bf16.mxu1 %vm1989_vm4, %v1988_v32 }
 0x308   : > { %v646_v45 = vpop.f32.mrf.mxu1 }
 0x309   : > { %v647_v46 = vadd.f32 %v1628_v44, %v646_v45 }
 0x30a   : > { %v1718_v47 = vpop.f32.mrf.mxu1 }
 0x30b   : > { %v2198_v48 = vpack.c.bf16 %v647_v46, %v647_v46 }
 0x30c   : > { %v649_v49 = vpop.f32.mrf.mxu1 }
 0x30d   : > { %716 = vrot.lane.b32.xlu0 %v2198_v48, %s1990_s30  ;;  %654 = vrot.lane.b32.xlu1 %v2198_v48, %s1991_s12  ;;  %s2002_s30 = smov 8   ;;  %s2003_s12 = smov 16  }
 0x30e   : > { %v1719_v50 = vpop.f32.mrf.mxu1 }
 0x37f   : > { %v655_v51 = vpop.permute.xlu1 %654  ;;  %v717_v56 = vpop.permute.xlu0 %716 }
 0x380   : > { %v661_v52 = vsel %vm656_vm6, %v655_v51, 0  ;;  %v727_v57 = vand.u32 %v2204_v55, %v717_v56 }
 0x381   : > { %1721 = vmatpush3.bf16.xpose.msra.mxu1 %v661_v52 }
 0x382   : > { %1726 = vmatprep.subr.bf16.mxu1 %v1988_v32 }
 0x388   : > { %1723 = vmatmul.mubr.msk.bf16.vlgmr.msra.gmra.mxu1 %vm656_vm6, %v2198_v48 }
 0x389   : > { %1727 = vmatpush3.bf16.msra.mxu1 %v727_v57  ;;  %1728 = vmatprep.mubr.msk.bf16.mxu1 %vm1989_vm4, %v1988_v32 }
 0x38a   : > { %1732 = vmatprep.subr.bf16.mxu1 %v1988_v32 }
 0x448   : > { %v697_v58 = vpop.f32.mrf.mxu1 }
 0x449   : > { %v704_v59 = vsel %vm703_vm9, %v697_v58, -inf }
 0x44a   : > { %705 = vmax.xlane.f32.xlu1 %v704_v59  ;;  %v1724_v60 = vpop.f32.mrf.mxu1 }
 0x44c   : > { %v700_v61 = vpop.f32.mrf.mxu1 }
 0x44e   : > { %v1725_v62 = vpop.f32.mrf.mxu1 }
 0x4d3   : > { %v706_v63 = vpop.xlane.xlu1 %705 }
 0x4d4   : > { %v707_v0 = vsub.f32 %v697_v58, %v706_v63 }
 0x4d6   : > { %v708_v1 = vmul.f32 1.442695, %v707_v0 }
 0x4d8   : > { %1903 = vpow2.f32 %v708_v1 }
 0x4e5   : > { %v1904_v2 = vpop.eup %1903 }
 0x4e6   : > { %v710_v3 = vsel %vm703_vm9, %v1904_v2, 0.0 }
 0x4e7   : > { %711 = vadd.xlane.f32.xlu0 %v710_v3 }
 0x4fd   : > { %778 = vrot.lane.b32.xlu0 %v2198_v48, %s1993_s13 }
 0x501   : > { %776 = vrot.lane.b32.xlu0 %v2198_v48, %s1994_s14  ;;  %s377_s14 = sand.u32 1, %s1977_s18  }
 0x570   : > { %v712_v4 = vpop.xlane.xlu0 %711 }
 0x571   : > { %1905 = vrcp.f32 %v712_v4 }
 0x574   : > { %v779_v7 = vpop.permute.xlu0 %778 }
 0x575   : > { %v784_v9 = vsel %vm656_vm6, %v779_v7, 0 }
 0x578   : > { %v777_v10 = vpop.permute.xlu0 %776 }
 0x57e   : > { %v1906_v5 = vpop.eup %1905 }
 0x57f   : > { %v714_v6 = vmul.f32 %v1906_v5, %v1904_v2 }
 0x581   : > { %v715_v8 = vpack.c.bf16 %v714_v6, %v714_v6 }
 0x583   : > { %1729 = vmatmul.mubr.msk.bf16.vlgmr.msra.gmra.mxu1 %vm718_vm10, %v715_v8 }
 0x584   : > { %1733 = vmatpush3.bf16.xpose.msra.mxu1 %v784_v9  ;;  %1734 = vmatprep.mubr.msk.bf16.mxu1 %vm1989_vm4, %v1988_v32 }
 0x585   : > { %1738 = vmatprep.subr.bf16.mxu1 %v1988_v32 }
 0x58b   : > { %1735 = vmatmul.mubr.msk.bf16.vlgmr.msra.gmra.mxu1 %vm656_vm6, %v777_v10 }
 0x58c   : > { %1740 = vmatprep.mubr.msk.bf16.mxu1 %vm1989_vm4, %v1988_v32 }
 0x643   : > { %v763_v11 = vpop.f32.mrf.mxu1 }
 0x644   : > { %v769_v13 = vpack.c.bf16 %v763_v11, %v763_v11 }
 0x645   : > { %v1730_v14 = vpop.f32.mrf.mxu1 }
 0x646   : > { %v774_v15 = vsel %vm772_vm13, %v769_v13, %v773_v12 }
 0x647   : > { %775 = vst [vmem:[#allocation3] sm:$0x7] %v774_v15  ;;  %v766_v16 = vpop.f32.mrf.mxu1 }
 0x649   : > { %v1731_v17 = vpop.f32.mrf.mxu1 }
 0x64b   : > { %v820_v18 = vpop.f32.mrf.mxu1 }
 0x64c   : > { %v826_v19 = vsel %vm703_vm9, %v820_v18, -inf }
 0x64d   : > { %827 = vmax.xlane.f32.xlu1 %v826_v19  ;;  %v1736_v20 = vpop.f32.mrf.mxu1 }
 0x64e   : > { %v895_v16 = vld [vmem:[#allocation3] sm:$0x7] }
 0x64f   : > { %v823_v21 = vpop.f32.mrf.mxu1 }
 0x651   : > { %v1737_v22 = vpop.f32.mrf.mxu1 }
 0x65e   : > { %838 = vrot.lane.b32.xlu1 %v2198_v48, %s1995_s15 }
 0x662   : > { %900 = vrot.lane.b32.xlu1 %v2198_v48, %s1996_s26 }
 0x666   : > { %898 = vrot.lane.b32.xlu1 %v2198_v48, %s1997_s16  ;;  %s2004_s16 = smov 24  }
 0x6d6   : > { %v828_v23 = vpop.xlane.xlu1 %827 }
 0x6d7   : > { %v829_v25 = vsub.f32 %v820_v18, %v828_v23 }
 0x6d9   : > { %v830_v26 = vmul.f32 1.442695, %v829_v25 }
 0x6da   : > { %v839_v27 = vpop.permute.xlu1 %838 }
 0x6db   : > { %1907 = vpow2.f32 %v830_v26  ;;  %v844_v28 = vand.u32 %v839_v27, %v2204_v55  ;;  %v1887_v27 = vld [vmem:[%s2417_s3 + $0x8] sm:$0xff]  }
 0x6dd   : > { %1739 = vmatpush3.bf16.msra.mxu1 %v844_v28  ;;  %v1888_v28 = vld [vmem:[%s2417_s3] sm:$0xff]  }
 0x6de   : > { %1744 = vmatprep.subr.bf16.mxu1 %v1988_v32  ;;  %v901_v35 = vpop.permute.xlu1 %900 }
 0x6df   : > { %v906_v37 = vsel %vm656_vm6, %v901_v35, 0 }
 0x6e2   : > { %v899_v39 = vpop.permute.xlu1 %898 }
 0x6e8   : > { %v1908_v29 = vpop.eup %1907 }
 0x6e9   : > { %v832_v30 = vsel %vm703_vm9, %v1908_v29, 0.0 }
 0x6ea   : > { %833 = vadd.xlane.f32.xlu0 %v832_v30 }
 0x700   : > { %960 = vrot.lane.b32.xlu0 %v2198_v48, %s1998_s22  ;;  %s378_s22 = scalar_lea.vmem [#allocation4], %s377_s14 }
 0x773   : > { %v834_v31 = vpop.xlane.xlu0 %833 }
 0x774   : > { %1909 = vrcp.f32 %v834_v31 }
 0x777   : > { %v961_v38 = vpop.permute.xlu0 %960 }
 0x778   : > { %v966_v40 = vand.u32 %v961_v38, %v2204_v55 }
 0x781   : > { %v1910_v33 = vpop.eup %1909 }
 0x782   : > { %v836_v34 = vmul.f32 %v1910_v33, %v1908_v29 }
 0x784   : > { %v837_v36 = vpack.c.bf16 %v836_v34, %v836_v34 }
 0x786   : > { %1741 = vmatmul.mubr.msk.bf16.vlgmr.msra.gmra.mxu1 %vm718_vm10, %v837_v36 }
 0x787   : > { %1745 = vmatpush3.bf16.xpose.msra.mxu1 %v906_v37  ;;  %1746 = vmatprep.mubr.msk.bf16.mxu1 %vm1989_vm4, %v1988_v32 }
 0x788   : > { %1750 = vmatprep.subr.bf16.mxu1 %v1988_v32 }
 0x78e   : > { %1747 = vmatmul.mubr.msk.bf16.vlgmr.msra.gmra.mxu1 %vm656_vm6, %v899_v39  ;;  %v1643_v39 = vld [vmem:[%s2422_s8 + $0x4] ss:$0 sm:$0xff] }
 0x78f   : > { %1751 = vmatpush3.bf16.msra.mxu1 %v966_v40  ;;  %1752 = vmatprep.mubr.msk.bf16.mxu1 %vm1989_vm4, %v1988_v32 }
 0x790   : > { %1756 = vmatprep.subr.bf16.mxu1 %v1988_v32 }
 0x846   : > { %v880_v41 = vpop.f32.mrf.mxu1 }
 0x847   : > { %v1671_v9 = vpack.c.bf16 %v880_v41, %v880_v41 }
 0x848   : > { %v1742_v42 = vpop.f32.mrf.mxu1 }
 0x84a   : > { %v883_v43 = vpop.f32.mrf.mxu1 }
 0x84c   : > { %v1743_v44 = vpop.f32.mrf.mxu1 }
 0x84e   : > { %v942_v45 = vpop.f32.mrf.mxu1 }
 0x84f   : > { %v948_v46 = vsel %vm703_vm9, %v942_v45, -inf }
 0x850   : > { %949 = vmax.xlane.f32.xlu1 %v948_v46  ;;  %v1748_v47 = vpop.f32.mrf.mxu1 }
 0x852   : > { %v945_v49 = vpop.f32.mrf.mxu1 }
 0x854   : > { %v1749_v50 = vpop.f32.mrf.mxu1 }
 0x8d9   : > { %v950_v51 = vpop.xlane.xlu1 %949 }
 0x8da   : > { %v951_v52 = vsub.f32 %v942_v45, %v950_v51 }
 0x8dc   : > { %v952_v53 = vmul.f32 1.442695, %v951_v52 }
 0x8de   : > { %1911 = vpow2.f32 %v952_v53  ;;  %v1889_v53 = vld [vmem:[%s2418_s4 + $0x8] sm:$0xff]  }
 0x8eb   : > { %v1912_v54 = vpop.eup %1911 }
 0x8ec   : > { %v954_v56 = vsel %vm703_vm9, %v1912_v54, 0.0 }
 0x8ed   : > { %955 = vadd.xlane.f32.xlu0 %v954_v56 }
 0x903   : > { %1022 = vrot.lane.b32.xlu0 %v2198_v48, %s1999_s24  ;;  %s1550_s24 = sshll.u32 %s378_s22, 4  ;;  %s2375_s24 = int_to_ptr.vmem [resolvable:$true] %s1550_s24 }
 0x904   : > { %s1925_s13 = scalar_lea.vmem %s2375_s24, 16 }
 0x905   : > { %p1926_p11 = scmp.ne.s32.totalorder %s2375_s24, %s1925_s13 }
 0x907   : > { %1020 = vrot.lane.b32.xlu0 %v2198_v48, %s2000_s25  ;;  %p1927_p12 = pnand %p1926_p11, %p2104_p5 }
 0x909   : > { %p1928_p13 = pneg %p1927_p12 }
 0x976   : > { %v956_v57 = vpop.xlane.xlu0 %955 }
 0x977   : > { %1913 = vrcp.f32 %v956_v57 }
 0x97a   : > { %v1023_v60 = vpop.permute.xlu0 %1022 }
 0x97b   : > { %v1028_v62 = vsel %vm656_vm6, %v1023_v60, 0 }
 0x97e   : > { %v1021_v63 = vpop.permute.xlu0 %1020 }
 0x984   : > { %v1914_v58 = vpop.eup %1913 }
 0x985   : > { %v958_v59 = vmul.f32 %v1914_v58, %v1912_v54 }
 0x987   : > { %v959_v61 = vpack.c.bf16 %v958_v59, %v958_v59  ;;  %v1647_v59 = vld [vmem:[%s2422_s8 + $0x5] ss:$0 sm:$0xff] }
 0x989   : > { %1753 = vmatmul.mubr.msk.bf16.vlgmr.msra.gmra.mxu1 %vm718_vm10, %v959_v61  ;;  %v1648_v61 = vld [vmem:[%s2422_s8 + $0x6] ss:$0 sm:$0xff] }
 0x98a   : > { %1757 = vmatpush3.bf16.xpose.msra.mxu1 %v1028_v62  ;;  %1758 = vmatprep.mubr.msk.bf16.mxu1 %vm1989_vm4, %v1988_v32 }
 0x98b   : > { %1768 = vmatprep.subr.bf16.mxu1 %v1988_v32 }
 0x991   : > { %1759 = vmatmul.mubr.msk.bf16.vlgmr.msra.gmra.mxu1 %vm656_vm6, %v1021_v63  ;;  %vm1016_vm6 = vmand %vm1015_vm2, %vm771_vm12 }
 0x992   : > { %1772 = vmatprep.mubr.msk.bf16.mxu1 %vm1989_vm4, %v1988_v32  ;;  %1769 = vmatpush3.bf16.msra.mxu1 %v1887_v27 }
 0x993   : > { %1770 = vmatprep.subr.bf16.mxu1 %v1988_v32 }
 0x996   : > { %1771 = vmatpush3.bf16.msra.mxu1 %v1888_v28 }
 0x997   : > { %1784 = vmatprep.subr.bf16.mxu1 %v1988_v32 }
 0xa49   : > { %v1002_v0 = vpop.f32.mrf.mxu1 }
 0xa4a   : > { %v1672_v10 = vpack.c.bf16 %v1002_v0, %v1002_v0 }
 0xa4b   : > { %v1754_v1 = vpop.f32.mrf.mxu1 }
 0xa4c   : > { %v1891_v1 = vld [vmem:[%s2419_s5 + $0x18] sm:$0xff]  }
 0xa4d   : > { %v1005_v2 = vpop.f32.mrf.mxu1 }
 0xa4e   : > { %v1892_v2 = vld [vmem:[%s2419_s5 + $0x10] sm:$0xff]  }
 0xa4f   : > { %v1755_v3 = vpop.f32.mrf.mxu1 }
 0xa50   : > { %v1893_v3 = vld [vmem:[%s2419_s5 + $0x8] sm:$0xff]  }
 0xa51   : > { %v1064_v4 = vpop.f32.mrf.mxu1 }
 0xa52   : > { %v1070_v5 = vsel %vm703_vm9, %v1064_v4, -inf }
 0xa53   : > { %1071 = vmax.xlane.f32.xlu1 %v1070_v5  ;;  %v1760_v6 = vpop.f32.mrf.mxu1  ;;  %v1649_v5 = vld [vmem:[%s2423_s9 + $0x1] ss:$0 sm:$0xff] }
 0xa55   : > { %v1067_v7 = vpop.f32.mrf.mxu1 }
 0xa57   : > { %v1761_v8 = vpop.f32.mrf.mxu1 }
 0xa64   : > { %1082 = vrot.lane.b32.xlu1 %v2198_v48, %s2001_s29 }
 0xa68   : > { %890 = vrot.lane.b32.xlu1 %v1671_v9, %s2002_s30 }
 0xa6c   : > { %1012 = vrot.lane.b32.xlu1 %v1672_v10, %s2003_s12  ;;  %s1538_s12 = scalar_lea.sflag [#allocation5], %s377_s14 }
 0xadc   : > { %v1072_v11 = vpop.xlane.xlu1 %1071 }
 0xadd   : > { %v1073_v12 = vsub.f32 %v1064_v4, %v1072_v11  ;;  %v1894_v4 = vld [vmem:[%s2419_s5] sm:$0xff]  }
 0xadf   : > { %v1074_v13 = vmul.f32 1.442695, %v1073_v12 }
 0xae0   : > { %v1083_v14 = vpop.permute.xlu1 %1082 }
 0xae1   : > { %1915 = vpow2.f32 %v1074_v13  ;;  %v1088_v15 = vand.u32 %v1083_v14, %v2204_v55 }
 0xae3   : > { %1763 = vmatpush3.bf16.msra.mxu0 %v1088_v15 }
 0xae4   : > { %v891_v17 = vpop.permute.xlu1 %890  ;;  %1776 = vmatprep.subr.bf16.mxu0 %v1988_v32 }
 0xae5   : > { %v896_v48 = vsel %vm894_vm15, %v891_v17, %v895_v16 }
 0xae6   : > { %897 = vst [vmem:[#allocation3] sm:$0x7] %v896_v48 }
 0xae8   : > { %v1013_v19 = vpop.permute.xlu1 %1012 }
 0xaed   : > { %v1017_v18 = vld [vmem:[#allocation3] sm:$0x7] }
 0xaee   : > { %v1916_v20 = vpop.eup %1915  ;;  %v1018_v21 = vsel %vm1016_vm6, %v1013_v19, %v1017_v18 }
 0xaef   : > { %1019 = vst [vmem:[#allocation3] sm:$0x7] %v1018_v21  ;;  %v1076_v22 = vsel %vm703_vm9, %v1916_v20, 0.0 }
 0xaf0   : > { %1077 = vadd.xlane.f32.xlu0 %v1076_v22 }
 0xaf6   : > { %v1139_v35 = vld [vmem:[#allocation3] sm:$0x7] }
 0xb79   : > { %v1078_v55 = vpop.xlane.xlu0 %1077 }
 0xb7a   : > { %1917 = vrcp.f32 %v1078_v55 }
 0xb87   : > { %v1918_v23 = vpop.eup %1917 }
 0xb88   : > { %v1080_v25 = vmul.f32 %v1918_v23, %v1916_v20  ;;  %v1653_v20 = vld [vmem:[%s2422_s8 + $0x7] ss:$0 sm:$0xff] }
 0xb8a   : > { %v1081_v26 = vpack.c.bf16 %v1080_v25, %v1080_v25 }
 0xb8c   : > { %1765 = vmatmul.mubr.msk.bf16.vlgmr.msra.gmra.mxu0 %vm718_vm10, %v1081_v26 }
 0xb8d   : > { %1780 = vmatprep.mubr.msk.bf16.mxu0 %vm1989_vm4, %v1988_v32  ;;  %1777 = vmatpush3.bf16.msra.mxu0 %v1889_v53 }
 0xb8e   : > { %1778 = vmatprep.subr.bf16.mxu0 %v1988_v32 }
 0xc4c   : > { %v1124_v29 = vpop.f32.mrf.mxu0 }
 0xc4d   : > { %v1673_v30 = vpack.c.bf16 %v1124_v29, %v1124_v29 }
 0xc4e   : > { %v1766_v31 = vpop.f32.mrf.mxu0 }
 0xc4f   : > { %1134 = vrot.lane.b32.xlu1 %v1673_v30, %s2004_s16  ;;  %s1667_s16 = sshll.u32 %s2087_s21, 4  ;;  %s2005_s21 = smov [#allocation4]  }
 0xc50   : > { %v1127_v33 = vpop.f32.mrf.mxu0  ;;  %s2373_s30 = scalar_lea.hbm %s2425_s11, %s1667_s16  ;;  %s1929_s15 = sshll.u32 %s2005_s21, 4  ;;  %s1930_s15 = int_to_ptr.vmem [resolvable:$false] %s1929_s15 }
 0xc51   : > { %s1931_s26 = scalar_lea.vmem %s1930_s15, 32  ;;  %p1932_p0 = scmp.lt.s32.totalorder %s2375_s24, %s1930_s15 }
 0xc52   : > { %v1767_v34 = vpop.f32.mrf.mxu0  ;;  %p1933_p1 = scmp.lt.s32.totalorder %s1931_s26, %s1925_s13 }
 0xc53   : > { %v1895_v34 = vld [vmem:[%s2420_s6 + $0x8] sm:$0xff]  }
 0xc54   : > { %p1934_p2 = por %p1933_p1, %p1932_p0 }
 0xc56   : > { %p1935_p3 = pnand %p1934_p2, %p1928_p13 }
 0xcc1   : > { %v1135_v36 = vpop.permute.xlu1 %1134 }
 0xcc2   : > { %v1140_v37 = vsel %vm1138_vm8, %v1135_v36, %v1139_v35  ;;  %v1896_v35 = vld [vmem:[%s2420_s6] sm:$0xff]  }
 0xcc3   : > { %1141 = vst [vmem:[#allocation3] sm:$0x7] %v1140_v37 }
 0xcca   : > { %v1142_v38 = vld [vmem:[#allocation3] sm:$0x7] }
 0xccb   : > { %1773 = vmatmul.mubr.msk.bf16.vlgmr.msra.gmra.mxu1 %vm608_vm5, %v1142_v38 }
 0xccc   : > { %1792 = vmatprep.mubr.msk.bf16.mxu1 %vm1989_vm4, %v1988_v32  ;;  %1785 = vmatpush3.bf16.msra.mxu1 %v1891_v1 }
 0xccd   : > { %1786 = vmatprep.subr.bf16.mxu1 %v1988_v32 }
 0xcd0   : > { %1787 = vmatpush3.bf16.msra.mxu1 %v1892_v2 }
 0xcd1   : > { %1788 = vmatprep.subr.bf16.mxu1 %v1988_v32 }
 0xcd4   : > { %1789 = vmatpush3.bf16.msra.mxu1 %v1893_v3 }
 0xcd5   : > { %1790 = vmatprep.subr.bf16.mxu1 %v1988_v32 }
 0xcd8   : > { %1791 = vmatpush3.bf16.msra.mxu1 %v1894_v4 }
 0xd8b   : > { %v1200_v40 = vpop.f32.mrf.mxu1 }
 0xd8c   : > { %v1201_v41 = vadd.f32 %v1643_v39, %v1200_v40  ;;  %v393_v40 = vld [vmem:[%s2422_s8 + $0x8] sm:$0x1] }
 0xd8d   : > { %v1774_v42 = vpop.f32.mrf.mxu1 }
 0xd8e   : > { %v2281_v43 = vadd.f32 %v1201_v41, %v2166_v24  ;;  %v1890_v24 = vld [vmem:[%s2418_s4] sm:$0xff]   ;;  %v394_v42 = vld [vmem:[%s2422_s8 + $0x9] sm:$0x1] }
 0xd8f   : > { %v1203_v44 = vpop.f32.mrf.mxu1  ;;  %1779 = vmatpush3.bf16.msra.mxu0 %v1890_v24 }
 0xd90   : > { %v1207_v45 = vsel %vm562_vm3, %v2281_v43, 0.0  ;;  %1796 = vmatprep.subr.bf16.mxu0 %v1988_v32 }
 0xd91   : > { %1208 = vadd.xlane.f32.xlu0 %v1207_v45  ;;  %v1775_v46 = vpop.f32.mrf.mxu1  ;;  %v1897_v45 = vld [vmem:[%s2421_s7 + $0x18] sm:$0xff]  }
 0xe1a   : > { %v1209_v47 = vpop.xlane.xlu0 %1208 }
 0xe1b   : > { %v1210_v49 = vmul.f32 0.03125, %v1209_v47  ;;  %v1898_v47 = vld [vmem:[%s2421_s7 + $0x10] sm:$0xff]  }
 0xe1d   : > { %v1211_v50 = vsub.f32 %v2281_v43, %v1210_v49  ;;  %v1899_v49 = vld [vmem:[%s2421_s7 + $0x8] sm:$0xff]  }
 0xe1f   : > { %v1212_v51 = vmul.f32 %v1211_v50, %v1211_v50 }
 0xe21   : > { %v1213_v52 = vsel %vm562_vm3, %v1212_v51, 0.0  ;;  %v397_v51 = vld [vmem:[%s2423_s9 + $0x2] sm:$0x1] }
 0xe22   : > { %1214 = vadd.xlane.f32.xlu1 %v1213_v52 }
 0xeab   : > { %v1215_v54 = vpop.xlane.xlu1 %1214 }
 0xeac   : > { %v1216_v56 = vmul.f32 0.03125, %v1215_v54 }
 0xeae   : > { %v1217_v57 = vadd.f32 1e-05, %v1216_v56 }
 0xeb0   : > { %1919 = vrsqrt.f32 %v1217_v57 }
 0xebd   : > { %v1920_v58 = vpop.eup %1919 }
 0xebe   : > { %v1219_v60 = vmul.f32 %v1920_v58, %v1211_v50  ;;  %v1900_v50 = vld [vmem:[%s2421_s7] sm:$0xff]  }
 0xec0   : > { %v1224_v62 = vmul.f32 %v1647_v59, %v1219_v60 }
 0xec2   : > { %v1229_v63 = vadd.f32 %v1648_v61, %v1224_v62 }
 0xec4   : > { %v1230_v0 = vpack.c.bf16 %v1229_v63, %v1229_v63 }
 0xec6   : > { %1781 = vmatmul.mubr.msk.bf16.vlgmr.msra.gmra.mxu0 %vm608_vm5, %v1230_v0 }
 0xec7   : > { %1800 = vmatprep.mubr.msk.bf16.mxu0 %vm1989_vm4, %v1988_v32  ;;  %1797 = vmatpush3.bf16.msra.mxu0 %v1895_v34 }
 0xec8   : > { %1798 = vmatprep.subr.bf16.mxu0 %v1988_v32 }
 0xecb   : > { %1799 = vmatpush3.bf16.msra.mxu0 %v1896_v35 }
 0xecc   : > { %1804 = vmatprep.subr.bf16.mxu0 %v1988_v32 }
 0xf86   : > { %v1288_v6 = vpop.f32.mrf.mxu0 }
 0xf87   : > { %v1289_v7 = vadd.f32 %v1649_v5, %v1288_v6 }
 0xf88   : > { %v1782_v8 = vpop.f32.mrf.mxu0 }
 0xf89   : > { %v1294_v9 = vmul.f32 %v1289_v7, %v1289_v7 }
 0xf8a   : > { %v1291_v10 = vpop.f32.mrf.mxu0 }
 0xf8b   : > { %v1295_v11 = vmul.f32 %v1294_v9, %v1289_v7 }
 0xf8c   : > { %v1783_v12 = vpop.f32.mrf.mxu0 }
 0xf8d   : > { %v1296_v13 = vmul.f32 0.044715, %v1295_v11 }
 0xf8f   : > { %v1297_v14 = vadd.f32 %v1296_v13, %v1289_v7 }
 0xf91   : > { %v1298_v15 = vmul.f32 0.7978846, %v1297_v14 }
 0xf93   : > { %1921 = vtanh.f32 %v1298_v15 }
 0xfa0   : > { %v1922_v16 = vpop.eup %1921 }
 0xfa1   : > { %v1300_v17 = vadd.f32 1.0, %v1922_v16 }
 0xfa3   : > { %v1301_v48 = vmul.f32 0.5, %v1300_v17 }
 0xfa5   : > { %v1302_v18 = vmul.f32 %v1301_v48, %v1289_v7 }
 0xfa7   : > { %v1303_v19 = vpack.c.bf16 %v1302_v18, %v1302_v18 }
 0xfa9   : > { %1793 = vmatmul.mubr.msk.bf16.vlgmr.msra.gmra.mxu1 %vm506_vm0, %v1303_v19 }
0x1069   : > { %v1377_v21 = vpop.f32.mrf.mxu1 }
0x106a   : > { %v1378_v22 = vadd.f32 %v1653_v20, %v1377_v21 }
0x106b   : > { %v1794_v55 = vpop.f32.mrf.mxu1 }
0x106c   : > { %v1383_v23 = vadd.f32 %v1378_v22, %v2281_v43 }
0x106d   : > { %v1380_v25 = vpop.f32.mrf.mxu1 }
0x106e   : > { %v1384_v26 = vsel %vm550_vm1, %v1383_v23, 0.0 }
0x106f   : > { %1385 = vadd.xlane.f32.xlu0 %v1384_v26  ;;  %v1795_v27 = vpop.f32.mrf.mxu1 }
0x10f8   : > { %v1386_v28 = vpop.xlane.xlu0 %1385 }
0x10f9   : > { %v1387_v29 = vmul.f32 0.03125, %v1386_v28 }
0x10fb   : > { %v1388_v30 = vsub.f32 %v1383_v23, %v1387_v29 }
0x10fd   : > { %v1389_v31 = vmul.f32 %v1388_v30, %v1388_v30 }
0x10ff   : > { %v1390_v33 = vsel %vm550_vm1, %v1389_v31, 0.0 }
0x1100   : > { %1391 = vadd.xlane.f32.xlu0 %v1390_v33 }
0x1189   : > { %v1392_v36 = vpop.xlane.xlu0 %1391 }
0x118a   : > { %v1393_v37 = vmul.f32 0.03125, %v1392_v36 }
0x118c   : > { %v1394_v38 = vadd.f32 1e-05, %v1393_v37 }
0x118e   : > { %1923 = vrsqrt.f32 %v1394_v38 }
0x119b   : > { %v1924_v39 = vpop.eup %1923 }
0x119c   : > { %v1396_v41 = vmul.f32 %v1924_v39, %v1388_v30 }
0x119e   : > { %v1397_v43 = vmul.f32 %v1396_v41, %v393_v40 }
0x11a0   : > { %v1398_v44 = vadd.f32 %v1397_v43, %v394_v42 }
0x11a2   : > { %v1399_v46 = vpack.c.bf16 %v1398_v44, %v1398_v44 }
0x11a4   : > { %1801 = vmatmul.mubr.msk.bf16.vlgmr.msra.gmra.mxu0 %vm608_vm5, %v1399_v46 }
0x11a5   : > { %1805 = vmatpush3.bf16.msra.mxu0 %v1897_v45  ;;  %1812 = vmatprep.mubr.msk.bf16.mxu0 %vm1989_vm4, %v1988_v32 }
0x11a6   : > { %1806 = vmatprep.subr.bf16.mxu0 %v1988_v32 }
0x11a9   : > { %1807 = vmatpush3.bf16.msra.mxu0 %v1898_v47 }
0x11aa   : > { %1808 = vmatprep.subr.bf16.mxu0 %v1988_v32 }
0x11ad   : > { %1809 = vmatpush3.bf16.msra.mxu0 %v1899_v49 }
0x11ae   : > { %1810 = vmatprep.subr.bf16.mxu0 %v1988_v32  ;;  %v398_v32 = vld [vmem:[%s2423_s9 + $0x3] sm:$0x1] }
0x11b1   : > { %1811 = vmatpush3.bf16.msra.mxu0 %v1900_v50 }
0x1264   : > { %v1453_v52 = vpop.f32.mrf.mxu0 }
0x1265   : > { %v1454_v53 = vadd.f32 %v1453_v52, %v397_v51 }
0x1266   : > { %v1802_v24 = vpop.f32.mrf.mxu0 }
0x1267   : > { %v1459_v54 = vmax.f32 %v1454_v53, 0.0 }
0x1268   : > { %v1456_v56 = vpop.f32.mrf.mxu0 }
0x1269   : > { %v1460_v57 = vpack.c.bf16 %v1459_v54, %v1459_v54 }
0x126a   : > { %v1803_v58 = vpop.f32.mrf.mxu0 }
0x126b   : > { %1813 = vmatmul.mubr.msk.bf16.vlgmr.msra.gmra.mxu0 %vm506_vm0, %v1460_v57 }
0x132b   : > { %v1530_v59 = vpop.f32.mrf.mxu0 }
0x132c   : > { %v1531_v60 = vadd.f32 %v1530_v59, %v398_v32 }
0x132d   : > { %v1814_v61 = vpop.f32.mrf.mxu0 }
0x132e   : > { %1536 = vst [vmem:[%s378_s22] sm:$0x1] %v1531_v60 }
0x132f   : > { %v1533_v62 = vpop.f32.mrf.mxu0 }
0x1330   : > { %1938 = shalt.err (!%p1935_p3)
}
0x1331   : > { %s1939_s16 = scalar_lea.hbm %s2373_s30, 16  ;;  %s1943_s25 = scalar_lea.hbm %s2425_s11, 32 }
0x1332   : > { %p1940_p4 = scmp.ne.s32.totalorder %s2373_s30, %s1939_s16  ;;  %p1944_p9 = scmp.lt.s32.totalorder %s2373_s30, %s2425_s11 }
0x1333   : > { %p1945_p10 = scmp.lt.s32.totalorder %s1943_s25, %s1939_s16 }
0x1334   : > { %p1941_p7 = pnand %p1940_p4, %p2104_p5 }
0x1335   : > { %p1946_p11 = por %p1945_p10, %p1944_p9 }
0x1336   : > { %p1942_p8 = pneg %p1941_p7 }
0x1338   : > { %p1947_p12 = pnand %p1946_p11, %p1942_p8 }
0x133a   : > { %1950 = shalt.err (!%p1947_p12)
}
0x133b   : > { %1816 = dma.vmem_to_hbm [thread:$0]  (%p2104_p5), %s2375_s24, 16, %s2373_s30, %s1538_s12   ;;  %v1815_v63 = vpop.f32.mrf.mxu0 }
0x133c PF: > { %p1822_p13 = scmp.ge.s32.totalorder %s1985_s20, 2  ;;  %s1562_s13 = sand.u32 1, %s1973_s17  }
0x133d   : > { %s1563_s15 = scalar_lea.sflag [#allocation5], %s1562_s13 }
0x133e   : > { %p1819_p0 = pnand %p1822_p13, %p2108_p6 }
0x1340   : > { %p1820_p1 = pneg %p1819_p0 }
0x1342   : > { %1968 = dma.done.wait (%p1820_p1), %s1563_s15, 16  }
0x1343   : > { %1970 = vsyncadd (%p1820_p1), %s1563_s15, 4294967280  ;;  %s2429_s27 = sld [smem:[#allocation7_spill]]  ;;  %p21_p2 = scmp.ge.s32.totalorder %s2091_s23, 4  }
0x1344   : > { %s2430_s17 = smov %s1977_s18  ;;  %s2431_s18 = smov %s1981_s19 }
0x1345   : > { %s2433_s20 = smov %s2091_s23  ;;  %23 = sbr.rel (!%p21_p2) target bundleno = 3 (0x3), region = 99 }
0x1349   : > { %s2432_s19 = smov %s2429_s27 }
0x134a   :  { %1567 = vsyncpa [#allocation5], 1 }
0x134b   :  { %1569 = vsyncpa [#allocation5 + $0x1], 1 }

</bundles_post_ra>
